<compile_context>
chip_gen: v7x
topology: tpu7x:2x2x1
jax: 0.10.0
libtpu: 0.0.40
codegen_flags: <defaults>
</compile_context>

<pallas_src>
import functools
import math

import jax
import jax.numpy as jnp
from jax.experimental import pallas as pl
from jax.experimental.pallas import tpu as pltpu

LOG2 = math.log(2.0)


def _softplus(x):
    # numerically stable softplus using only exp/log (always lowerable)
    return jnp.maximum(x, 0.0) + jnp.log(1.0 + jnp.exp(-jnp.abs(x)))


def _round_up(x, m):
    return ((x + m - 1) // m) * m


def _vmem_capacity_bytes():
    try:
        info = pltpu.get_tpu_info()
        cap = getattr(info, "vmem_capacity_bytes", None)
        if cap:
            return int(cap)
    except Exception:
        pass
    return 64 * 1024 * 1024  # conservative default (v7x per-TC)


def _interaction_loop_kernel(src_ref, dst_ref,                        # SMEM (scalar prefetch)
                             h_ref, ea_ref,
                             wm1_ref, wm2_ref, bm2_ref,
                             wl1_ref, wl2_ref, bl2_ref,
                             wout_ref, bout_ref,
                             o_ref,
                             h_vmem, xh_vmem, we_vmem, agg_vmem, acc_vmem,
                             *, n_edges, c_col, unroll):
    b = pl.program_id(0)

    @pl.when(b == 0)
    def _init():
        # Node features persist in VMEM across the layer grid.
        h_vmem[...] = h_ref[...]
        # One-time zero: rows of zero-in-degree / padded nodes are never stored
        # by the segment scatter; rows that are stored get overwritten every
        # layer, so no per-layer zero-init is needed.
        agg_vmem[...] = jnp.zeros_like(agg_vmem)

    # ---- edge filter MLP: Linear -> ShiftedSoftplus -> Linear, then cutoff.
    #      bm1 is folded into wm1 via ea's packed ones column; the SSP "-log 2"
    #      is folded into bm2 (wrapper).  Padded rows of wm2 are exactly zero,
    #      which keeps the softplus(0)=log2 of padded t-columns inert.
    ea = ea_ref[...]                                                   # [Ep, Gp]
    t = _softplus(jnp.dot(ea, wm1_ref[...], preferred_element_type=jnp.float32))
    we = jnp.dot(t, wm2_ref[...], preferred_element_type=jnp.float32) + bm2_ref[...]
    cfac = ea[:, c_col:c_col + 1]      # cosine-cutoff factor (0 on padded edge rows)
    we_vmem[...] = we * cfac                                           # [Ep, Hp]

    # ---- _CFConv.lin1 (no bias) on the current node features.
    h_cur = h_vmem[...]
    xh_vmem[...] = jnp.dot(h_cur, wl1_ref[...], preferred_element_type=jnp.float32)

    # ---- gather (x_j = xh[src]) * W_e and destination-segment sum.
    #      Edges are sorted by dst in the wrapper; dst_ref is sentinel-padded so
    #      dst_ref[e+1] is always readable and the last segment always flushes.
    acc_vmem[...] = jnp.zeros_like(acc_vmem)

    def edge_step(e):
        s = src_ref[e]
        d = dst_ref[e]
        acc_vmem[...] += xh_vmem[pl.ds(s, 1), :] * we_vmem[pl.ds(e, 1), :]

        @pl.when(dst_ref[e + 1] != d)          # last edge of this dst segment
        def _flush():
            agg_vmem[pl.ds(d, 1), :] = acc_vmem[...]
            acc_vmem[...] = jnp.zeros_like(acc_vmem)

    n_blocks = n_edges // unroll

    def blk_body(blk, carry):
        base = blk * unroll
        for u in range(unroll):                # trace-time unroll: loads overlap
            edge_step(base + u)
        return carry

    jax.lax.fori_loop(0, n_blocks, blk_body, 0)
    for e in range(n_blocks * unroll, n_edges):    # static remainder, inlined
        edge_step(e)

    # ---- _CFConv.lin2, interaction-block ShiftedSoftplus, outer softplus, residual.
    conv = jnp.dot(agg_vmem[...], wl2_ref[...],
                   preferred_element_type=jnp.float32) + bl2_ref[...]
    h_new = h_cur + _softplus(_softplus(conv) - LOG2)
    h_vmem[...] = h_new

    # ---- final output projection, written only on the last layer.
    @pl.when(b == pl.num_programs(0) - 1)
    def _finalize():
        o_ref[...] = (jnp.dot(h_new, wout_ref[...],
                              preferred_element_type=jnp.float32)
                      + bout_ref[...]).astype(o_ref.dtype)


def interaction_block_loop(h, edge_index, edge_weight, edge_attr, params,
                           *, cutoff, n_conv, unroll=8):
    """Pads feature dims to the 128-lane width, sorts edges by destination,
    packs the cutoff factor and bm1 into spare edge-feature columns, folds the
    first SSP bias shift, and calls the layer-pipelined Pallas kernel."""
    N, H = h.shape
    E, G = edge_attr.shape
    OUT = params["wout"].shape[1]

    # Keep 128-lane padding (NOT 256): HIDDEN << 128 already over-pads the MXU.
    Hp = _round_up(max(H, 128), 128)
    Gp = _round_up(max(G + 2, 128), 128)     # +2 cols: cutoff factor, ones (bm1 fold)
    Op = _round_up(max(OUT, 128), 128)
    Np = _round_up(N, 8)
    Ep = _round_up(max(E, 8), 8)
    assert Gp >= G + 2

    f32 = jnp.float32

    # ---- sort edges by destination -> the scatter-add becomes a segment sum.
    src = edge_index[0].astype(jnp.int32)
    dst = edge_index[1].astype(jnp.int32)
    perm = jnp.argsort(dst)
    src_s = src[perm]
    dst_s = dst[perm]
    ea_s = edge_attr.astype(f32)[perm]
    ew_s = edge_weight.astype(f32)[perm]
    # sentinel-padded dst: the kernel peeks dst[e+1] to detect segment ends.
    dst_pad = jnp.concatenate([dst_s, jnp.full((8,), N, jnp.int32)])

    # ---- edge features: cutoff factor packed in column G, ones in column G+1.
    C = 0.5 * (jnp.cos(ew_s * (math.pi / cutoff)) + 1.0)
    ea_p = jnp.zeros((Ep, Gp), f32)
    ea_p = ea_p.at[:E, :G].set(ea_s)
    ea_p = ea_p.at[:E, G].set(C)
    ea_p = ea_p.at[:E, G + 1].set(1.0)

    h_p = jnp.zeros((Np, Hp), f32).at[:N, :H].set(h.astype(f32))

    # NOTE: every padded weight row/col MUST stay exactly zero (kept in f32) --
    # the padded softplus(0)=log2 columns of t and the +log2/layer drift in the
    # padded columns of h are inert only because they always hit zero rows of
    # wm2 / wl1 / wout, and padded node/output rows are sliced off below.
    def pad2(x, r, c):
        x = x.astype(f32)
        return jnp.pad(x, ((0, r - x.shape[0]), (0, c - x.shape[1])))

    def pad3(x, r, c):
        x = x.astype(f32)
        return jnp.pad(x, ((0, 0), (0, r - x.shape[1]), (0, c - x.shape[2])))

    # bm1 folded into wm1 (ones column G+1); row G (cutoff column) stays zero.
    wm1_p = jnp.zeros((n_conv, Gp, Hp), f32)
    wm1_p = wm1_p.at[:, :G, :H].set(params["wm1"].astype(f32))
    wm1_p = wm1_p.at[:, G + 1, :H].set(params["bm1"].astype(f32)[:, 0, :])
    # SSP(t) @ W2 + b2 == softplus(t) @ W2 + (b2 - log2 * sum_in(W2)); valid
    # because the extra padded rows of the padded wm2 are exactly zero.
    bm2_eff = params["bm2"] - LOG2 * params["wm2"].sum(axis=1, keepdims=True)

    wm2_p = pad3(params["wm2"], Hp, Hp)
    bm2_p = pad3(bm2_eff, 1, Hp)
    wl1_p = pad3(params["wl1"], Hp, Hp)
    wl2_p = pad3(params["wl2"], Hp, Hp)
    bl2_p = pad3(params["bl2"], 1, Hp)
    wout_p = pad2(params["wout"], Hp, Op)
    bout_p = pad2(params["bout"], 1, Op)

    # ---- VMEM budget derived from the actual buffers (default double-buffered
    #      pipelined blocks + resident scratch), clamped to the chip capacity.
    itemsize = 4
    block_elems = (Np * Hp + Ep * Gp + Gp * Hp + 3 * Hp * Hp + 2 * Hp
                   + Hp * Op + Op + Np * Op)
    scratch_elems = 3 * Np * Hp + Ep * Hp + Hp
    needed = (2 * block_elems + scratch_elems) * itemsize
    cap = _vmem_capacity_bytes()
    vmem_limit = int(min(max(2 * needed + (4 << 20), 32 << 20), int(cap * 0.85)))

    flops = int(n_conv * (2 * Ep * Gp * Hp + 2 * Ep * Hp * Hp
                          + 4 * Np * Hp * Hp + 3 * E * Hp)
                + 2 * Np * Hp * Op)
    transcendentals = int(n_conv * (2 * Ep * Hp + 4 * Np * Hp))
    bytes_accessed = int(itemsize * (Np * Hp + Ep * Gp + Np * Op + Hp * Op + Op
                                     + n_conv * (Gp * Hp + 3 * Hp * Hp + 2 * Hp))
                         + 4 * (E + E + 8))

    kern = functools.partial(_interaction_loop_kernel,
                             n_edges=E, c_col=G, unroll=unroll)

    grid_spec = pltpu.PrefetchScalarGridSpec(
        num_scalar_prefetch=2,                       # src_sorted, dst_sorted -> SMEM
        grid=(n_conv,),
        in_specs=[
            pl.BlockSpec((Np, Hp), lambda b, *_: (0, 0)),             # h (read at b==0)
            pl.BlockSpec((Ep, Gp), lambda b, *_: (0, 0)),             # edge feats (+cutoff,+ones)
            pl.BlockSpec((None, Gp, Hp), lambda b, *_: (b, 0, 0)),    # wm1[b] (bm1 folded)
            pl.BlockSpec((None, Hp, Hp), lambda b, *_: (b, 0, 0)),    # wm2[b]
            pl.BlockSpec((None, 1, Hp), lambda b, *_: (b, 0, 0)),     # bm2[b] (SSP fold)
            pl.BlockSpec((None, Hp, Hp), lambda b, *_: (b, 0, 0)),    # wl1[b]
            pl.BlockSpec((None, Hp, Hp), lambda b, *_: (b, 0, 0)),    # wl2[b]
            pl.BlockSpec((None, 1, Hp), lambda b, *_: (b, 0, 0)),     # bl2[b]
            pl.BlockSpec((Hp, Op), lambda b, *_: (0, 0)),             # wout
            pl.BlockSpec((1, Op), lambda b, *_: (0, 0)),              # bout
        ],
        out_specs=pl.BlockSpec((Np, Op), lambda b, *_: (0, 0)),
        scratch_shapes=[
            pltpu.VMEM((Np, Hp), f32),   # resident node features h (across layers)
            pltpu.VMEM((Np, Hp), f32),   # xh = h @ wl1
            pltpu.VMEM((Ep, Hp), f32),   # edge filters W_e
            pltpu.VMEM((Np, Hp), f32),   # per-destination aggregates (written once/row)
            pltpu.VMEM((1, Hp), f32),    # segment accumulator row
        ],
    )

    out_p = pl.pallas_call(
        kern,
        out_shape=jax.ShapeDtypeStruct((Np, Op), f32),
        grid_spec=grid_spec,
        compiler_params=pltpu.CompilerParams(
            dimension_semantics=("arbitrary",),      # h carries across layers
            vmem_limit_bytes=vmem_limit),
        cost_estimate=pl.CostEstimate(flops=flops,
                                      transcendentals=transcendentals,
                                      bytes_accessed=bytes_accessed),
    )(src_s, dst_pad, h_p, ea_p, wm1_p, wm2_p, bm2_p,
      wl1_p, wl2_p, bl2_p, wout_p, bout_p)

    return out_p[:N, :OUT]


def reference(h, edge_index, edge_weight, edge_attr, params, *, cutoff, n_conv):
    """Pure-JAX reference implementing the PyTorch forward exactly (f32 dots)."""
    dot = functools.partial(jnp.dot, precision=jax.lax.Precision.HIGHEST)
    src, dst = edge_index[0], edge_index[1]
    C = (0.5 * (jnp.cos(edge_weight * (math.pi / cutoff)) + 1.0))[:, None]
    for b in range(n_conv):
        t = jax.nn.softplus(dot(edge_attr, params["wm1"][b]) + params["bm1"][b]) - LOG2
        We = (dot(t, params["wm2"][b]) + params["bm2"][b]) * C
        xh = dot(h, params["wl1"][b])
        msg = xh[src] * We
        agg = jnp.zeros_like(xh).at[dst].add(msg)
        conv = dot(agg, params["wl2"][b]) + params["bl2"][b]
        h = h + jax.nn.softplus(jax.nn.softplus(conv) - LOG2)
    return dot(h, params["wout"]) + params["bout"]


def _xavier(key, fan_in, fan_out):
    a = math.sqrt(6.0 / (fan_in + fan_out))
    return jax.random.uniform(key, (fan_in, fan_out), jnp.float32, -a, a)


def init_params(key, hidden, gaussians, out_channels, n_conv):
    """Deterministic parameter init; weights stored as [in, out]."""
    keys = jax.random.split(key, 6 * n_conv + 2)
    wm1, bm1, wm2, bm2, wl1, wl2, bl2 = [], [], [], [], [], [], []
    for b in range(n_conv):
        k = keys[6 * b: 6 * (b + 1)]
        wm1.append(_xavier(k[0], gaussians, hidden))    # mlp[0]
        bm1.append(jnp.zeros((1, hidden), jnp.float32))
        wm2.append(_xavier(k[1], hidden, hidden))        # mlp[2]
        bm2.append(jax.random.normal(k[2], (1, hidden), jnp.float32) * 0.01)
        wl1.append(_xavier(k[3], hidden, hidden))        # cfconv.lin1 (no bias)
        wl2.append(_xavier(k[4], hidden, hidden))        # cfconv.lin2
        bl2.append(jnp.zeros((1, hidden), jnp.float32))
    return {
        "wm1": jnp.stack(wm1), "bm1": jnp.stack(bm1),
        "wm2": jnp.stack(wm2), "bm2": jnp.stack(bm2),
        "wl1": jnp.stack(wl1), "wl2": jnp.stack(wl2), "bl2": jnp.stack(bl2),
        "wout": _xavier(keys[-2], hidden, out_channels),
        "bout": jax.random.normal(keys[-1], (1, out_channels), jnp.float32) * 0.01,
    }


if __name__ == "__main__":
    # small shapes consistent with the module
    N, E = 16, 48                 # nodes, edges
    HIDDEN = 32                   # num_node_hidden_channels (= num_filters)
    GAUSS = 16                    # num_edge_gaussians
    OUT = 24                      # num_node_interaction_channels
    CUTOFF = 10.0
    N_CONV = 2

    root = jax.random.PRNGKey(0)
    k_h, k_ei, k_ew, k_ea, k_p = jax.random.split(root, 5)

    h = jax.random.normal(k_h, (N, HIDDEN), jnp.float32)
    edge_index = jax.random.randint(k_ei, (2, E), 0, N, dtype=jnp.int32)
    edge_weight = jax.random.uniform(k_ew, (E,), jnp.float32, 0.0, CUTOFF)
    edge_attr = jax.random.normal(k_ea, (E, GAUSS), jnp.float32)
    params = init_params(k_p, HIDDEN, GAUSS, OUT, N_CONV)

    out = interaction_block_loop(h, edge_index, edge_weight, edge_attr, params,
                                 cutoff=CUTOFF, n_conv=N_CONV)
    out = jax.block_until_ready(out)

    ref = reference(h, edge_index, edge_weight, edge_attr, params,
                    cutoff=CUTOFF, n_conv=N_CONV)
    assert out.shape == (N, OUT)
    assert jnp.allclose(out, ref, atol=2e-4, rtol=2e-4), "mismatch vs reference"

    print("KERNEL_OK")
</pallas_src>

<mosaic_0001>
module attributes {stable_mosaic.version = 11 : i64} {
  func.func @_interaction_loop_kernel(%arg0: i32, %arg1: memref<48xi32, #tpu.memory_space<smem>>, %arg2: memref<56xi32, #tpu.memory_space<smem>>, %arg3: memref<16x128xf32, #tpu.memory_space<vmem>>, %arg4: memref<48x128xf32, #tpu.memory_space<vmem>>, %arg5: memref<1x128x128xf32, #tpu.memory_space<vmem>>, %arg6: memref<1x128x128xf32, #tpu.memory_space<vmem>>, %arg7: memref<1x1x128xf32, #tpu.memory_space<vmem>>, %arg8: memref<1x128x128xf32, #tpu.memory_space<vmem>>, %arg9: memref<1x128x128xf32, #tpu.memory_space<vmem>>, %arg10: memref<1x1x128xf32, #tpu.memory_space<vmem>>, %arg11: memref<128x128xf32, #tpu.memory_space<vmem>>, %arg12: memref<1x128xf32, #tpu.memory_space<vmem>>, %arg13: memref<16x128xf32, #tpu.memory_space<vmem>>, %arg14: memref<16x128xf32, #tpu.memory_space<vmem>>, %arg15: memref<16x128xf32, #tpu.memory_space<vmem>>, %arg16: memref<48x128xf32, #tpu.memory_space<vmem>>, %arg17: memref<16x128xf32, #tpu.memory_space<vmem>>, %arg18: memref<1x128xf32, #tpu.memory_space<vmem>>) attributes {dimension_semantics = [#tpu.dimension_semantics<arbitrary>], iteration_bounds = array<i64: 2>, scalar_prefetch = 2 : i64, scratch_operands = 5 : i64, tpu.core_type = #tpu.core_type<tc>, window_params = [{pipeline_mode = #tpu.pipeline_mode<synchronous>, transform_indices = @transform_0, window_bounds = array<i64: 16, 128>}, {pipeline_mode = #tpu.pipeline_mode<synchronous>, transform_indices = @transform_1, window_bounds = array<i64: 48, 128>}, {transform_indices = @transform_2, window_bounds = array<i64: 1, 128, 128>}, {transform_indices = @transform_3, window_bounds = array<i64: 1, 128, 128>}, {transform_indices = @transform_4, window_bounds = array<i64: 1, 1, 128>}, {transform_indices = @transform_5, window_bounds = array<i64: 1, 128, 128>}, {transform_indices = @transform_6, window_bounds = array<i64: 1, 128, 128>}, {transform_indices = @transform_7, window_bounds = array<i64: 1, 1, 128>}, {pipeline_mode = #tpu.pipeline_mode<synchronous>, transform_indices = @transform_8, window_bounds = array<i64: 128, 128>}, {pipeline_mode = #tpu.pipeline_mode<synchronous>, transform_indices = @transform_9, window_bounds = array<i64: 1, 128>}, {pipeline_mode = #tpu.pipeline_mode<synchronous>, transform_indices = @transform_10, window_bounds = array<i64: 16, 128>}]} {
    %c0_i32 = arith.constant 0 : i32
    %0 = arith.cmpi eq, %arg0, %c0_i32 : i32
    %1 = arith.extui %0 : i1 to i32
    %c0_i32_0 = arith.constant 0 : i32
    %2 = arith.cmpi ne, %1, %c0_i32_0 : i32
    scf.if %2 {
      %c0_50 = arith.constant 0 : index
      %c0_51 = arith.constant 0 : index
      %71 = vector.load %arg3[%c0_50, %c0_51] : memref<16x128xf32, #tpu.memory_space<vmem>>, vector<16x128xf32>
      %c0_52 = arith.constant 0 : index
      %c0_53 = arith.constant 0 : index
      %72 = vector.load %arg14[%c0_52, %c0_53] : memref<16x128xf32, #tpu.memory_space<vmem>>, vector<16x128xf32>
      tpu.vector_store %arg14[%c0_52, %c0_53], %71 {strides = array<i32>} : memref<16x128xf32, #tpu.memory_space<vmem>>, vector<16x128xf32>,
      %cst_54 = arith.constant 0.000000e+00 : f32
      %73 = vector.broadcast %cst_54 : f32 to vector<16x128xf32>
      %c0_55 = arith.constant 0 : index
      %c0_56 = arith.constant 0 : index
      %74 = vector.load %arg17[%c0_55, %c0_56] : memref<16x128xf32, #tpu.memory_space<vmem>>, vector<16x128xf32>
      tpu.vector_store %arg17[%c0_55, %c0_56], %73 {strides = array<i32>} : memref<16x128xf32, #tpu.memory_space<vmem>>, vector<16x128xf32>,
    } else {
    }
    %c0 = arith.constant 0 : index
    %c0_1 = arith.constant 0 : index
    %3 = vector.load %arg4[%c0, %c0_1] : memref<48x128xf32, #tpu.memory_space<vmem>>, vector<48x128xf32>
    %c0_2 = arith.constant 0 : index
    %c0_3 = arith.constant 0 : index
    %c0_4 = arith.constant 0 : index
    %4 = vector.load %arg5[%c0_2, %c0_3, %c0_4] : memref<1x128x128xf32, #tpu.memory_space<vmem>>, vector<1x128x128xf32>
    %5 = vector.shape_cast %4 : vector<1x128x128xf32> to vector<128x128xf32>
    %cst = arith.constant dense<0.000000e+00> : vector<48x128xf32>
    %6 = tpu.matmul %3, %5, %cst {dimension_numbers = #tpu.dot_dimension_numbers<[1], [0], [0], [1], [0, 0, 1, 1], [], []>} : vector<48x128xf32>, vector<128x128xf32>, vector<48x128xf32> -> vector<48x128xf32>
    %cst_5 = arith.constant 0.000000e+00 : f32
    %7 = vector.broadcast %cst_5 : f32 to vector<48x128xf32>
    %8 = arith.maximumf %6, %7 : vector<48x128xf32>
    %9 = math.absf %6 : vector<48x128xf32>
    %cst_6 = arith.constant 0.000000e+00 : f32
    %10 = vector.broadcast %cst_6 : f32 to vector<48x128xf32>
    %11 = arith.subf %10, %9 : vector<48x128xf32>
    %12 = math.exp %11 : vector<48x128xf32>
    %cst_7 = arith.constant 1.000000e+00 : f32
    %13 = vector.broadcast %cst_7 : f32 to vector<48x128xf32>
    %14 = arith.addf %13, %12 : vector<48x128xf32>
    %15 = math.log %14 : vector<48x128xf32>
    %16 = arith.addf %8, %15 : vector<48x128xf32>
    %c0_8 = arith.constant 0 : index
    %c0_9 = arith.constant 0 : index
    %c0_10 = arith.constant 0 : index
    %17 = vector.load %arg6[%c0_8, %c0_9, %c0_10] : memref<1x128x128xf32, #tpu.memory_space<vmem>>, vector<1x128x128xf32>
    %18 = vector.shape_cast %17 : vector<1x128x128xf32> to vector<128x128xf32>
    %cst_11 = arith.constant dense<0.000000e+00> : vector<48x128xf32>
    %19 = tpu.matmul %16, %18, %cst_11 {dimension_numbers = #tpu.dot_dimension_numbers<[1], [0], [0], [1], [0, 0, 1, 1], [], []>} : vector<48x128xf32>, vector<128x128xf32>, vector<48x128xf32> -> vector<48x128xf32>
    %c0_12 = arith.constant 0 : index
    %c0_13 = arith.constant 0 : index
    %c0_14 = arith.constant 0 : index
    %20 = vector.load %arg7[%c0_12, %c0_13, %c0_14] : memref<1x1x128xf32, #tpu.memory_space<vmem>>, vector<1x1x128xf32>
    %21 = vector.shape_cast %20 : vector<1x1x128xf32> to vector<1x128xf32>
    %22 = vector.broadcast %21 : vector<1x128xf32> to vector<48x128xf32>
    %23 = arith.addf %19, %22 : vector<48x128xf32>
    %24 = vector.extract_strided_slice %3 {offsets = [0, 16], sizes = [48, 1], strides = [1, 1]} : vector<48x128xf32> to vector<48x1xf32>
    %25 = vector.broadcast %24 : vector<48x1xf32> to vector<48x128xf32>
    %26 = arith.mulf %23, %25 : vector<48x128xf32>
    %c0_15 = arith.constant 0 : index
    %c0_16 = arith.constant 0 : index
    %27 = vector.load %arg16[%c0_15, %c0_16] : memref<48x128xf32, #tpu.memory_space<vmem>>, vector<48x128xf32>
    tpu.vector_store %arg16[%c0_15, %c0_16], %26 {strides = array<i32>} : memref<48x128xf32, #tpu.memory_space<vmem>>, vector<48x128xf32>,
    %c0_17 = arith.constant 0 : index
    %c0_18 = arith.constant 0 : index
    %28 = vector.load %arg14[%c0_17, %c0_18] : memref<16x128xf32, #tpu.memory_space<vmem>>, vector<16x128xf32>
    %c0_19 = arith.constant 0 : index
    %c0_20 = arith.constant 0 : index
    %c0_21 = arith.constant 0 : index
    %29 = vector.load %arg8[%c0_19, %c0_20, %c0_21] : memref<1x128x128xf32, #tpu.memory_space<vmem>>, vector<1x128x128xf32>
    %30 = vector.shape_cast %29 : vector<1x128x128xf32> to vector<128x128xf32>
    %cst_22 = arith.constant dense<0.000000e+00> : vector<16x128xf32>
    %31 = tpu.matmul %28, %30, %cst_22 {dimension_numbers = #tpu.dot_dimension_numbers<[1], [0], [0], [1], [0, 0, 1, 1], [], []>} : vector<16x128xf32>, vector<128x128xf32>, vector<16x128xf32> -> vector<16x128xf32>
    %c0_23 = arith.constant 0 : index
    %c0_24 = arith.constant 0 : index
    %32 = vector.load %arg15[%c0_23, %c0_24] : memref<16x128xf32, #tpu.memory_space<vmem>>, vector<16x128xf32>
    tpu.vector_store %arg15[%c0_23, %c0_24], %31 {strides = array<i32>} : memref<16x128xf32, #tpu.memory_space<vmem>>, vector<16x128xf32>,
    %cst_25 = arith.constant 0.000000e+00 : f32
    %33 = vector.broadcast %cst_25 : f32 to vector<1x128xf32>
    %c0_26 = arith.constant 0 : index
    %c0_27 = arith.constant 0 : index
    %34 = vector.load %arg18[%c0_26, %c0_27] : memref<1x128xf32, #tpu.memory_space<vmem>>, vector<1x128xf32>
    tpu.vector_store %arg18[%c0_26, %c0_27], %33 {strides = array<i32>} : memref<1x128xf32, #tpu.memory_space<vmem>>, vector<1x128xf32>,
    %c0_i32_28 = arith.constant 0 : i32
    %c6_i32 = arith.constant 6 : i32
    %35 = arith.addi %c0_i32_28, %c6_i32 : i32
    %c1_i32 = arith.constant 1 : i32
    scf.for %arg19 = %c0_i32_28 to %35 step %c1_i32  : i32 {
      %c8_i32 = arith.constant 8 : i32
      %71 = arith.muli %arg19, %c8_i32 : i32
      %c0_i32_50 = arith.constant 0 : i32
      %72 = arith.addi %71, %c0_i32_50 : i32
      %73 = arith.index_cast %72 : i32 to index
      %74 = memref.load %arg1[%73] : memref<48xi32, #tpu.memory_space<smem>>
      %75 = arith.index_cast %72 : i32 to index
      %76 = memref.load %arg2[%75] : memref<56xi32, #tpu.memory_space<smem>>
      %c0_51 = arith.constant 0 : index
      %c0_52 = arith.constant 0 : index
      %77 = vector.load %arg18[%c0_51, %c0_52] : memref<1x128xf32, #tpu.memory_space<vmem>>, vector<1x128xf32>
      %78 = arith.index_cast %74 : i32 to index
      %c0_53 = arith.constant 0 : index
      %79 = vector.load %arg15[%78, %c0_53] : memref<16x128xf32, #tpu.memory_space<vmem>>, vector<1x128xf32>
      %80 = arith.index_cast %72 : i32 to index
      %c0_54 = arith.constant 0 : index
      %81 = vector.load %arg16[%80, %c0_54] : memref<48x128xf32, #tpu.memory_space<vmem>>, vector<1x128xf32>
      %82 = arith.mulf %79, %81 : vector<1x128xf32>
      %83 = arith.addf %77, %82 : vector<1x128xf32>
      %c0_55 = arith.constant 0 : index
      %c0_56 = arith.constant 0 : index
      %84 = vector.load %arg18[%c0_55, %c0_56] : memref<1x128xf32, #tpu.memory_space<vmem>>, vector<1x128xf32>
      tpu.vector_store %arg18[%c0_55, %c0_56], %83 {strides = array<i32>} : memref<1x128xf32, #tpu.memory_space<vmem>>, vector<1x128xf32>,
      %c1_i32_57 = arith.constant 1 : i32
      %85 = arith.addi %72, %c1_i32_57 : i32
      %86 = arith.index_cast %85 : i32 to index
      %87 = memref.load %arg2[%86] : memref<56xi32, #tpu.memory_space<smem>>
      %88 = arith.cmpi ne, %87, %76 : i32
      %89 = arith.extui %88 : i1 to i32
      %c0_i32_58 = arith.constant 0 : i32
      %90 = arith.cmpi ne, %89, %c0_i32_58 : i32
      scf.if %90 {
        %c0_117 = arith.constant 0 : index
        %c0_118 = arith.constant 0 : index
        %224 = vector.load %arg18[%c0_117, %c0_118] : memref<1x128xf32, #tpu.memory_space<vmem>>, vector<1x128xf32>
        %225 = arith.index_cast %76 : i32 to index
        %c0_119 = arith.constant 0 : index
        %226 = vector.load %arg17[%225, %c0_119] : memref<16x128xf32, #tpu.memory_space<vmem>>, vector<1x128xf32>
        tpu.vector_store %arg17[%225, %c0_119], %224 {strides = array<i32>} : memref<16x128xf32, #tpu.memory_space<vmem>>, vector<1x128xf32>,
        %cst_120 = arith.constant 0.000000e+00 : f32
        %227 = vector.broadcast %cst_120 : f32 to vector<1x128xf32>
        %c0_121 = arith.constant 0 : index
        %c0_122 = arith.constant 0 : index
        %228 = vector.load %arg18[%c0_121, %c0_122] : memref<1x128xf32, #tpu.memory_space<vmem>>, vector<1x128xf32>
        tpu.vector_store %arg18[%c0_121, %c0_122], %227 {strides = array<i32>} : memref<1x128xf32, #tpu.memory_space<vmem>>, vector<1x128xf32>,
      } else {
      }
      %c1_i32_59 = arith.constant 1 : i32
      %91 = arith.addi %71, %c1_i32_59 : i32
      %92 = arith.index_cast %91 : i32 to index
      %93 = memref.load %arg1[%92] : memref<48xi32, #tpu.memory_space<smem>>
      %94 = arith.index_cast %91 : i32 to index
      %95 = memref.load %arg2[%94] : memref<56xi32, #tpu.memory_space<smem>>
      %c0_60 = arith.constant 0 : index
      %c0_61 = arith.constant 0 : index
      %96 = vector.load %arg18[%c0_60, %c0_61] : memref<1x128xf32, #tpu.memory_space<vmem>>, vector<1x128xf32>
      %97 = arith.index_cast %93 : i32 to index
      %c0_62 = arith.constant 0 : index
      %98 = vector.load %arg15[%97, %c0_62] : memref<16x128xf32, #tpu.memory_space<vmem>>, vector<1x128xf32>
      %99 = arith.index_cast %91 : i32 to index
      %c0_63 = arith.constant 0 : index
      %100 = vector.load %arg16[%99, %c0_63] : memref<48x128xf32, #tpu.memory_space<vmem>>, vector<1x128xf32>
      %101 = arith.mulf %98, %100 : vector<1x128xf32>
      %102 = arith.addf %96, %101 : vector<1x128xf32>
      %c0_64 = arith.constant 0 : index
      %c0_65 = arith.constant 0 : index
      %103 = vector.load %arg18[%c0_64, %c0_65] : memref<1x128xf32, #tpu.memory_space<vmem>>, vector<1x128xf32>
      tpu.vector_store %arg18[%c0_64, %c0_65], %102 {strides = array<i32>} : memref<1x128xf32, #tpu.memory_space<vmem>>, vector<1x128xf32>,
      %c1_i32_66 = arith.constant 1 : i32
      %104 = arith.addi %91, %c1_i32_66 : i32
      %105 = arith.index_cast %104 : i32 to index
      %106 = memref.load %arg2[%105] : memref<56xi32, #tpu.memory_space<smem>>
      %107 = arith.cmpi ne, %106, %95 : i32
      %108 = arith.extui %107 : i1 to i32
      %c0_i32_67 = arith.constant 0 : i32
      %109 = arith.cmpi ne, %108, %c0_i32_67 : i32
      scf.if %109 {
        %c0_117 = arith.constant 0 : index
        %c0_118 = arith.constant 0 : index
        %224 = vector.load %arg18[%c0_117, %c0_118] : memref<1x128xf32, #tpu.memory_space<vmem>>, vector<1x128xf32>
        %225 = arith.index_cast %95 : i32 to index
        %c0_119 = arith.constant 0 : index
        %226 = vector.load %arg17[%225, %c0_119] : memref<16x128xf32, #tpu.memory_space<vmem>>, vector<1x128xf32>
        tpu.vector_store %arg17[%225, %c0_119], %224 {strides = array<i32>} : memref<16x128xf32, #tpu.memory_space<vmem>>, vector<1x128xf32>,
        %cst_120 = arith.constant 0.000000e+00 : f32
        %227 = vector.broadcast %cst_120 : f32 to vector<1x128xf32>
        %c0_121 = arith.constant 0 : index
        %c0_122 = arith.constant 0 : index
        %228 = vector.load %arg18[%c0_121, %c0_122] : memref<1x128xf32, #tpu.memory_space<vmem>>, vector<1x128xf32>
        tpu.vector_store %arg18[%c0_121, %c0_122], %227 {strides = array<i32>} : memref<1x128xf32, #tpu.memory_space<vmem>>, vector<1x128xf32>,
      } else {
      }
      %c2_i32 = arith.constant 2 : i32
      %110 = arith.addi %71, %c2_i32 : i32
      %111 = arith.index_cast %110 : i32 to index
      %112 = memref.load %arg1[%111] : memref<48xi32, #tpu.memory_space<smem>>
      %113 = arith.index_cast %110 : i32 to index
      %114 = memref.load %arg2[%113] : memref<56xi32, #tpu.memory_space<smem>>
      %c0_68 = arith.constant 0 : index
      %c0_69 = arith.constant 0 : index
      %115 = vector.load %arg18[%c0_68, %c0_69] : memref<1x128xf32, #tpu.memory_space<vmem>>, vector<1x128xf32>
      %116 = arith.index_cast %112 : i32 to index
      %c0_70 = arith.constant 0 : index
      %117 = vector.load %arg15[%116, %c0_70] : memref<16x128xf32, #tpu.memory_space<vmem>>, vector<1x128xf32>
      %118 = arith.index_cast %110 : i32 to index
      %c0_71 = arith.constant 0 : index
      %119 = vector.load %arg16[%118, %c0_71] : memref<48x128xf32, #tpu.memory_space<vmem>>, vector<1x128xf32>
      %120 = arith.mulf %117, %119 : vector<1x128xf32>
      %121 = arith.addf %115, %120 : vector<1x128xf32>
      %c0_72 = arith.constant 0 : index
      %c0_73 = arith.constant 0 : index
      %122 = vector.load %arg18[%c0_72, %c0_73] : memref<1x128xf32, #tpu.memory_space<vmem>>, vector<1x128xf32>
      tpu.vector_store %arg18[%c0_72, %c0_73], %121 {strides = array<i32>} : memref<1x128xf32, #tpu.memory_space<vmem>>, vector<1x128xf32>,
      %c1_i32_74 = arith.constant 1 : i32
      %123 = arith.addi %110, %c1_i32_74 : i32
      %124 = arith.index_cast %123 : i32 to index
      %125 = memref.load %arg2[%124] : memref<56xi32, #tpu.memory_space<smem>>
      %126 = arith.cmpi ne, %125, %114 : i32
      %127 = arith.extui %126 : i1 to i32
      %c0_i32_75 = arith.constant 0 : i32
      %128 = arith.cmpi ne, %127, %c0_i32_75 : i32
      scf.if %128 {
        %c0_117 = arith.constant 0 : index
        %c0_118 = arith.constant 0 : index
        %224 = vector.load %arg18[%c0_117, %c0_118] : memref<1x128xf32, #tpu.memory_space<vmem>>, vector<1x128xf32>
        %225 = arith.index_cast %114 : i32 to index
        %c0_119 = arith.constant 0 : index
        %226 = vector.load %arg17[%225, %c0_119] : memref<16x128xf32, #tpu.memory_space<vmem>>, vector<1x128xf32>
        tpu.vector_store %arg17[%225, %c0_119], %224 {strides = array<i32>} : memref<16x128xf32, #tpu.memory_space<vmem>>, vector<1x128xf32>,
        %cst_120 = arith.constant 0.000000e+00 : f32
        %227 = vector.broadcast %cst_120 : f32 to vector<1x128xf32>
        %c0_121 = arith.constant 0 : index
        %c0_122 = arith.constant 0 : index
        %228 = vector.load %arg18[%c0_121, %c0_122] : memref<1x128xf32, #tpu.memory_space<vmem>>, vector<1x128xf32>
        tpu.vector_store %arg18[%c0_121, %c0_122], %227 {strides = array<i32>} : memref<1x128xf32, #tpu.memory_space<vmem>>, vector<1x128xf32>,
      } else {
      }
      %c3_i32 = arith.constant 3 : i32
      %129 = arith.addi %71, %c3_i32 : i32
      %130 = arith.index_cast %129 : i32 to index
      %131 = memref.load %arg1[%130] : memref<48xi32, #tpu.memory_space<smem>>
      %132 = arith.index_cast %129 : i32 to index
      %133 = memref.load %arg2[%132] : memref<56xi32, #tpu.memory_space<smem>>
      %c0_76 = arith.constant 0 : index
      %c0_77 = arith.constant 0 : index
      %134 = vector.load %arg18[%c0_76, %c0_77] : memref<1x128xf32, #tpu.memory_space<vmem>>, vector<1x128xf32>
      %135 = arith.index_cast %131 : i32 to index
      %c0_78 = arith.constant 0 : index
      %136 = vector.load %arg15[%135, %c0_78] : memref<16x128xf32, #tpu.memory_space<vmem>>, vector<1x128xf32>
      %137 = arith.index_cast %129 : i32 to index
      %c0_79 = arith.constant 0 : index
      %138 = vector.load %arg16[%137, %c0_79] : memref<48x128xf32, #tpu.memory_space<vmem>>, vector<1x128xf32>
      %139 = arith.mulf %136, %138 : vector<1x128xf32>
      %140 = arith.addf %134, %139 : vector<1x128xf32>
      %c0_80 = arith.constant 0 : index
      %c0_81 = arith.constant 0 : index
      %141 = vector.load %arg18[%c0_80, %c0_81] : memref<1x128xf32, #tpu.memory_space<vmem>>, vector<1x128xf32>
      tpu.vector_store %arg18[%c0_80, %c0_81], %140 {strides = array<i32>} : memref<1x128xf32, #tpu.memory_space<vmem>>, vector<1x128xf32>,
      %c1_i32_82 = arith.constant 1 : i32
      %142 = arith.addi %129, %c1_i32_82 : i32
      %143 = arith.index_cast %142 : i32 to index
      %144 = memref.load %arg2[%143] : memref<56xi32, #tpu.memory_space<smem>>
      %145 = arith.cmpi ne, %144, %133 : i32
      %146 = arith.extui %145 : i1 to i32
      %c0_i32_83 = arith.constant 0 : i32
      %147 = arith.cmpi ne, %146, %c0_i32_83 : i32
      scf.if %147 {
        %c0_117 = arith.constant 0 : index
        %c0_118 = arith.constant 0 : index
        %224 = vector.load %arg18[%c0_117, %c0_118] : memref<1x128xf32, #tpu.memory_space<vmem>>, vector<1x128xf32>
        %225 = arith.index_cast %133 : i32 to index
        %c0_119 = arith.constant 0 : index
        %226 = vector.load %arg17[%225, %c0_119] : memref<16x128xf32, #tpu.memory_space<vmem>>, vector<1x128xf32>
        tpu.vector_store %arg17[%225, %c0_119], %224 {strides = array<i32>} : memref<16x128xf32, #tpu.memory_space<vmem>>, vector<1x128xf32>,
        %cst_120 = arith.constant 0.000000e+00 : f32
        %227 = vector.broadcast %cst_120 : f32 to vector<1x128xf32>
        %c0_121 = arith.constant 0 : index
        %c0_122 = arith.constant 0 : index
        %228 = vector.load %arg18[%c0_121, %c0_122] : memref<1x128xf32, #tpu.memory_space<vmem>>, vector<1x128xf32>
        tpu.vector_store %arg18[%c0_121, %c0_122], %227 {strides = array<i32>} : memref<1x128xf32, #tpu.memory_space<vmem>>, vector<1x128xf32>,
      } else {
      }
      %c4_i32 = arith.constant 4 : i32
      %148 = arith.addi %71, %c4_i32 : i32
      %149 = arith.index_cast %148 : i32 to index
      %150 = memref.load %arg1[%149] : memref<48xi32, #tpu.memory_space<smem>>
      %151 = arith.index_cast %148 : i32 to index
      %152 = memref.load %arg2[%151] : memref<56xi32, #tpu.memory_space<smem>>
      %c0_84 = arith.constant 0 : index
      %c0_85 = arith.constant 0 : index
      %153 = vector.load %arg18[%c0_84, %c0_85] : memref<1x128xf32, #tpu.memory_space<vmem>>, vector<1x128xf32>
      %154 = arith.index_cast %150 : i32 to index
      %c0_86 = arith.constant 0 : index
      %155 = vector.load %arg15[%154, %c0_86] : memref<16x128xf32, #tpu.memory_space<vmem>>, vector<1x128xf32>
      %156 = arith.index_cast %148 : i32 to index
      %c0_87 = arith.constant 0 : index
      %157 = vector.load %arg16[%156, %c0_87] : memref<48x128xf32, #tpu.memory_space<vmem>>, vector<1x128xf32>
      %158 = arith.mulf %155, %157 : vector<1x128xf32>
      %159 = arith.addf %153, %158 : vector<1x128xf32>
      %c0_88 = arith.constant 0 : index
      %c0_89 = arith.constant 0 : index
      %160 = vector.load %arg18[%c0_88, %c0_89] : memref<1x128xf32, #tpu.memory_space<vmem>>, vector<1x128xf32>
      tpu.vector_store %arg18[%c0_88, %c0_89], %159 {strides = array<i32>} : memref<1x128xf32, #tpu.memory_space<vmem>>, vector<1x128xf32>,
      %c1_i32_90 = arith.constant 1 : i32
      %161 = arith.addi %148, %c1_i32_90 : i32
      %162 = arith.index_cast %161 : i32 to index
      %163 = memref.load %arg2[%162] : memref<56xi32, #tpu.memory_space<smem>>
      %164 = arith.cmpi ne, %163, %152 : i32
      %165 = arith.extui %164 : i1 to i32
      %c0_i32_91 = arith.constant 0 : i32
      %166 = arith.cmpi ne, %165, %c0_i32_91 : i32
      scf.if %166 {
        %c0_117 = arith.constant 0 : index
        %c0_118 = arith.constant 0 : index
        %224 = vector.load %arg18[%c0_117, %c0_118] : memref<1x128xf32, #tpu.memory_space<vmem>>, vector<1x128xf32>
        %225 = arith.index_cast %152 : i32 to index
        %c0_119 = arith.constant 0 : index
        %226 = vector.load %arg17[%225, %c0_119] : memref<16x128xf32, #tpu.memory_space<vmem>>, vector<1x128xf32>
        tpu.vector_store %arg17[%225, %c0_119], %224 {strides = array<i32>} : memref<16x128xf32, #tpu.memory_space<vmem>>, vector<1x128xf32>,
        %cst_120 = arith.constant 0.000000e+00 : f32
        %227 = vector.broadcast %cst_120 : f32 to vector<1x128xf32>
        %c0_121 = arith.constant 0 : index
        %c0_122 = arith.constant 0 : index
        %228 = vector.load %arg18[%c0_121, %c0_122] : memref<1x128xf32, #tpu.memory_space<vmem>>, vector<1x128xf32>
        tpu.vector_store %arg18[%c0_121, %c0_122], %227 {strides = array<i32>} : memref<1x128xf32, #tpu.memory_space<vmem>>, vector<1x128xf32>,
      } else {
      }
      %c5_i32 = arith.constant 5 : i32
      %167 = arith.addi %71, %c5_i32 : i32
      %168 = arith.index_cast %167 : i32 to index
      %169 = memref.load %arg1[%168] : memref<48xi32, #tpu.memory_space<smem>>
      %170 = arith.index_cast %167 : i32 to index
      %171 = memref.load %arg2[%170] : memref<56xi32, #tpu.memory_space<smem>>
      %c0_92 = arith.constant 0 : index
      %c0_93 = arith.constant 0 : index
      %172 = vector.load %arg18[%c0_92, %c0_93] : memref<1x128xf32, #tpu.memory_space<vmem>>, vector<1x128xf32>
      %173 = arith.index_cast %169 : i32 to index
      %c0_94 = arith.constant 0 : index
      %174 = vector.load %arg15[%173, %c0_94] : memref<16x128xf32, #tpu.memory_space<vmem>>, vector<1x128xf32>
      %175 = arith.index_cast %167 : i32 to index
      %c0_95 = arith.constant 0 : index
      %176 = vector.load %arg16[%175, %c0_95] : memref<48x128xf32, #tpu.memory_space<vmem>>, vector<1x128xf32>
      %177 = arith.mulf %174, %176 : vector<1x128xf32>
      %178 = arith.addf %172, %177 : vector<1x128xf32>
      %c0_96 = arith.constant 0 : index
      %c0_97 = arith.constant 0 : index
      %179 = vector.load %arg18[%c0_96, %c0_97] : memref<1x128xf32, #tpu.memory_space<vmem>>, vector<1x128xf32>
      tpu.vector_store %arg18[%c0_96, %c0_97], %178 {strides = array<i32>} : memref<1x128xf32, #tpu.memory_space<vmem>>, vector<1x128xf32>,
      %c1_i32_98 = arith.constant 1 : i32
      %180 = arith.addi %167, %c1_i32_98 : i32
      %181 = arith.index_cast %180 : i32 to index
      %182 = memref.load %arg2[%181] : memref<56xi32, #tpu.memory_space<smem>>
      %183 = arith.cmpi ne, %182, %171 : i32
      %184 = arith.extui %183 : i1 to i32
      %c0_i32_99 = arith.constant 0 : i32
      %185 = arith.cmpi ne, %184, %c0_i32_99 : i32
      scf.if %185 {
        %c0_117 = arith.constant 0 : index
        %c0_118 = arith.constant 0 : index
        %224 = vector.load %arg18[%c0_117, %c0_118] : memref<1x128xf32, #tpu.memory_space<vmem>>, vector<1x128xf32>
        %225 = arith.index_cast %171 : i32 to index
        %c0_119 = arith.constant 0 : index
        %226 = vector.load %arg17[%225, %c0_119] : memref<16x128xf32, #tpu.memory_space<vmem>>, vector<1x128xf32>
        tpu.vector_store %arg17[%225, %c0_119], %224 {strides = array<i32>} : memref<16x128xf32, #tpu.memory_space<vmem>>, vector<1x128xf32>,
        %cst_120 = arith.constant 0.000000e+00 : f32
        %227 = vector.broadcast %cst_120 : f32 to vector<1x128xf32>
        %c0_121 = arith.constant 0 : index
        %c0_122 = arith.constant 0 : index
        %228 = vector.load %arg18[%c0_121, %c0_122] : memref<1x128xf32, #tpu.memory_space<vmem>>, vector<1x128xf32>
        tpu.vector_store %arg18[%c0_121, %c0_122], %227 {strides = array<i32>} : memref<1x128xf32, #tpu.memory_space<vmem>>, vector<1x128xf32>,
      } else {
      }
      %c6_i32_100 = arith.constant 6 : i32
      %186 = arith.addi %71, %c6_i32_100 : i32
      %187 = arith.index_cast %186 : i32 to index
      %188 = memref.load %arg1[%187] : memref<48xi32, #tpu.memory_space<smem>>
      %189 = arith.index_cast %186 : i32 to index
      %190 = memref.load %arg2[%189] : memref<56xi32, #tpu.memory_space<smem>>
      %c0_101 = arith.constant 0 : index
      %c0_102 = arith.constant 0 : index
      %191 = vector.load %arg18[%c0_101, %c0_102] : memref<1x128xf32, #tpu.memory_space<vmem>>, vector<1x128xf32>
      %192 = arith.index_cast %188 : i32 to index
      %c0_103 = arith.constant 0 : index
      %193 = vector.load %arg15[%192, %c0_103] : memref<16x128xf32, #tpu.memory_space<vmem>>, vector<1x128xf32>
      %194 = arith.index_cast %186 : i32 to index
      %c0_104 = arith.constant 0 : index
      %195 = vector.load %arg16[%194, %c0_104] : memref<48x128xf32, #tpu.memory_space<vmem>>, vector<1x128xf32>
      %196 = arith.mulf %193, %195 : vector<1x128xf32>
      %197 = arith.addf %191, %196 : vector<1x128xf32>
      %c0_105 = arith.constant 0 : index
      %c0_106 = arith.constant 0 : index
      %198 = vector.load %arg18[%c0_105, %c0_106] : memref<1x128xf32, #tpu.memory_space<vmem>>, vector<1x128xf32>
      tpu.vector_store %arg18[%c0_105, %c0_106], %197 {strides = array<i32>} : memref<1x128xf32, #tpu.memory_space<vmem>>, vector<1x128xf32>,
      %c1_i32_107 = arith.constant 1 : i32
      %199 = arith.addi %186, %c1_i32_107 : i32
      %200 = arith.index_cast %199 : i32 to index
      %201 = memref.load %arg2[%200] : memref<56xi32, #tpu.memory_space<smem>>
      %202 = arith.cmpi ne, %201, %190 : i32
      %203 = arith.extui %202 : i1 to i32
      %c0_i32_108 = arith.constant 0 : i32
      %204 = arith.cmpi ne, %203, %c0_i32_108 : i32
      scf.if %204 {
        %c0_117 = arith.constant 0 : index
        %c0_118 = arith.constant 0 : index
        %224 = vector.load %arg18[%c0_117, %c0_118] : memref<1x128xf32, #tpu.memory_space<vmem>>, vector<1x128xf32>
        %225 = arith.index_cast %190 : i32 to index
        %c0_119 = arith.constant 0 : index
        %226 = vector.load %arg17[%225, %c0_119] : memref<16x128xf32, #tpu.memory_space<vmem>>, vector<1x128xf32>
        tpu.vector_store %arg17[%225, %c0_119], %224 {strides = array<i32>} : memref<16x128xf32, #tpu.memory_space<vmem>>, vector<1x128xf32>,
        %cst_120 = arith.constant 0.000000e+00 : f32
        %227 = vector.broadcast %cst_120 : f32 to vector<1x128xf32>
        %c0_121 = arith.constant 0 : index
        %c0_122 = arith.constant 0 : index
        %228 = vector.load %arg18[%c0_121, %c0_122] : memref<1x128xf32, #tpu.memory_space<vmem>>, vector<1x128xf32>
        tpu.vector_store %arg18[%c0_121, %c0_122], %227 {strides = array<i32>} : memref<1x128xf32, #tpu.memory_space<vmem>>, vector<1x128xf32>,
      } else {
      }
      %c7_i32 = arith.constant 7 : i32
      %205 = arith.addi %71, %c7_i32 : i32
      %206 = arith.index_cast %205 : i32 to index
      %207 = memref.load %arg1[%206] : memref<48xi32, #tpu.memory_space<smem>>
      %208 = arith.index_cast %205 : i32 to index
      %209 = memref.load %arg2[%208] : memref<56xi32, #tpu.memory_space<smem>>
      %c0_109 = arith.constant 0 : index
      %c0_110 = arith.constant 0 : index
      %210 = vector.load %arg18[%c0_109, %c0_110] : memref<1x128xf32, #tpu.memory_space<vmem>>, vector<1x128xf32>
      %211 = arith.index_cast %207 : i32 to index
      %c0_111 = arith.constant 0 : index
      %212 = vector.load %arg15[%211, %c0_111] : memref<16x128xf32, #tpu.memory_space<vmem>>, vector<1x128xf32>
      %213 = arith.index_cast %205 : i32 to index
      %c0_112 = arith.constant 0 : index
      %214 = vector.load %arg16[%213, %c0_112] : memref<48x128xf32, #tpu.memory_space<vmem>>, vector<1x128xf32>
      %215 = arith.mulf %212, %214 : vector<1x128xf32>
      %216 = arith.addf %210, %215 : vector<1x128xf32>
      %c0_113 = arith.constant 0 : index
      %c0_114 = arith.constant 0 : index
      %217 = vector.load %arg18[%c0_113, %c0_114] : memref<1x128xf32, #tpu.memory_space<vmem>>, vector<1x128xf32>
      tpu.vector_store %arg18[%c0_113, %c0_114], %216 {strides = array<i32>} : memref<1x128xf32, #tpu.memory_space<vmem>>, vector<1x128xf32>,
      %c1_i32_115 = arith.constant 1 : i32
      %218 = arith.addi %205, %c1_i32_115 : i32
      %219 = arith.index_cast %218 : i32 to index
      %220 = memref.load %arg2[%219] : memref<56xi32, #tpu.memory_space<smem>>
      %221 = arith.cmpi ne, %220, %209 : i32
      %222 = arith.extui %221 : i1 to i32
      %c0_i32_116 = arith.constant 0 : i32
      %223 = arith.cmpi ne, %222, %c0_i32_116 : i32
      scf.if %223 {
        %c0_117 = arith.constant 0 : index
        %c0_118 = arith.constant 0 : index
        %224 = vector.load %arg18[%c0_117, %c0_118] : memref<1x128xf32, #tpu.memory_space<vmem>>, vector<1x128xf32>
        %225 = arith.index_cast %209 : i32 to index
        %c0_119 = arith.constant 0 : index
        %226 = vector.load %arg17[%225, %c0_119] : memref<16x128xf32, #tpu.memory_space<vmem>>, vector<1x128xf32>
        tpu.vector_store %arg17[%225, %c0_119], %224 {strides = array<i32>} : memref<16x128xf32, #tpu.memory_space<vmem>>, vector<1x128xf32>,
        %cst_120 = arith.constant 0.000000e+00 : f32
        %227 = vector.broadcast %cst_120 : f32 to vector<1x128xf32>
        %c0_121 = arith.constant 0 : index
        %c0_122 = arith.constant 0 : index
        %228 = vector.load %arg18[%c0_121, %c0_122] : memref<1x128xf32, #tpu.memory_space<vmem>>, vector<1x128xf32>
        tpu.vector_store %arg18[%c0_121, %c0_122], %227 {strides = array<i32>} : memref<1x128xf32, #tpu.memory_space<vmem>>, vector<1x128xf32>,
      } else {
      }
    }
    %c6_i32_29 = arith.constant 6 : i32
    %c0_30 = arith.constant 0 : index
    %c0_31 = arith.constant 0 : index
    %36 = vector.load %arg17[%c0_30, %c0_31] : memref<16x128xf32, #tpu.memory_space<vmem>>, vector<16x128xf32>
    %c0_32 = arith.constant 0 : index
    %c0_33 = arith.constant 0 : index
    %c0_34 = arith.constant 0 : index
    %37 = vector.load %arg9[%c0_32, %c0_33, %c0_34] : memref<1x128x128xf32, #tpu.memory_space<vmem>>, vector<1x128x128xf32>
    %38 = vector.shape_cast %37 : vector<1x128x128xf32> to vector<128x128xf32>
    %cst_35 = arith.constant dense<0.000000e+00> : vector<16x128xf32>
    %39 = tpu.matmul %36, %38, %cst_35 {dimension_numbers = #tpu.dot_dimension_numbers<[1], [0], [0], [1], [0, 0, 1, 1], [], []>} : vector<16x128xf32>, vector<128x128xf32>, vector<16x128xf32> -> vector<16x128xf32>
    %c0_36 = arith.constant 0 : index
    %c0_37 = arith.constant 0 : index
    %c0_38 = arith.constant 0 : index
    %40 = vector.load %arg10[%c0_36, %c0_37, %c0_38] : memref<1x1x128xf32, #tpu.memory_space<vmem>>, vector<1x1x128xf32>
    %41 = vector.shape_cast %40 : vector<1x1x128xf32> to vector<1x128xf32>
    %42 = vector.broadcast %41 : vector<1x128xf32> to vector<16x128xf32>
    %43 = arith.addf %39, %42 : vector<16x128xf32>
    %cst_39 = arith.constant 0.000000e+00 : f32
    %44 = vector.broadcast %cst_39 : f32 to vector<16x128xf32>
    %45 = arith.maximumf %43, %44 : vector<16x128xf32>
    %46 = math.absf %43 : vector<16x128xf32>
    %cst_40 = arith.constant 0.000000e+00 : f32
    %47 = vector.broadcast %cst_40 : f32 to vector<16x128xf32>
    %48 = arith.subf %47, %46 : vector<16x128xf32>
    %49 = math.exp %48 : vector<16x128xf32>
    %cst_41 = arith.constant 1.000000e+00 : f32
    %50 = vector.broadcast %cst_41 : f32 to vector<16x128xf32>
    %51 = arith.addf %50, %49 : vector<16x128xf32>
    %52 = math.log %51 : vector<16x128xf32>
    %53 = arith.addf %45, %52 : vector<16x128xf32>
    %cst_42 = arith.constant 0.693147182 : f32
    %54 = vector.broadcast %cst_42 : f32 to vector<16x128xf32>
    %55 = arith.subf %53, %54 : vector<16x128xf32>
    %cst_43 = arith.constant 0.000000e+00 : f32
    %56 = vector.broadcast %cst_43 : f32 to vector<16x128xf32>
    %57 = arith.maximumf %55, %56 : vector<16x128xf32>
    %58 = math.absf %55 : vector<16x128xf32>
    %cst_44 = arith.constant 0.000000e+00 : f32
    %59 = vector.broadcast %cst_44 : f32 to vector<16x128xf32>
    %60 = arith.subf %59, %58 : vector<16x128xf32>
    %61 = math.exp %60 : vector<16x128xf32>
    %cst_45 = arith.constant 1.000000e+00 : f32
    %62 = vector.broadcast %cst_45 : f32 to vector<16x128xf32>
    %63 = arith.addf %62, %61 : vector<16x128xf32>
    %64 = math.log %63 : vector<16x128xf32>
    %65 = arith.addf %57, %64 : vector<16x128xf32>
    %66 = arith.addf %28, %65 : vector<16x128xf32>
    %c0_46 = arith.constant 0 : index
    %c0_47 = arith.constant 0 : index
    %67 = vector.load %arg14[%c0_46, %c0_47] : memref<16x128xf32, #tpu.memory_space<vmem>>, vector<16x128xf32>
    tpu.vector_store %arg14[%c0_46, %c0_47], %66 {strides = array<i32>} : memref<16x128xf32, #tpu.memory_space<vmem>>, vector<16x128xf32>,
    %c1_i32_48 = arith.constant 1 : i32
    %68 = arith.cmpi eq, %arg0, %c1_i32_48 : i32
    %69 = arith.extui %68 : i1 to i32
    %c0_i32_49 = arith.constant 0 : i32
    %70 = arith.cmpi ne, %69, %c0_i32_49 : i32
    scf.if %70 {
      %c0_50 = arith.constant 0 : index
      %c0_51 = arith.constant 0 : index
      %71 = vector.load %arg11[%c0_50, %c0_51] : memref<128x128xf32, #tpu.memory_space<vmem>>, vector<128x128xf32>
      %cst_52 = arith.constant dense<0.000000e+00> : vector<16x128xf32>
      %72 = tpu.matmul %66, %71, %cst_52 {dimension_numbers = #tpu.dot_dimension_numbers<[1], [0], [0], [1], [0, 0, 1, 1], [], []>} : vector<16x128xf32>, vector<128x128xf32>, vector<16x128xf32> -> vector<16x128xf32>
      %c0_53 = arith.constant 0 : index
      %c0_54 = arith.constant 0 : index
      %73 = vector.load %arg12[%c0_53, %c0_54] : memref<1x128xf32, #tpu.memory_space<vmem>>, vector<1x128xf32>
      %74 = vector.broadcast %73 : vector<1x128xf32> to vector<16x128xf32>
      %75 = arith.addf %72, %74 : vector<16x128xf32>
      %c0_55 = arith.constant 0 : index
      %c0_56 = arith.constant 0 : index
      %76 = vector.load %arg13[%c0_55, %c0_56] : memref<16x128xf32, #tpu.memory_space<vmem>>, vector<16x128xf32>
      tpu.vector_store %arg13[%c0_55, %c0_56], %75 {strides = array<i32>} : memref<16x128xf32, #tpu.memory_space<vmem>>, vector<16x128xf32>,
    } else {
    }
    return
  }
  func.func @transform_0(%arg0: i32, %arg1: memref<48xi32, #tpu.memory_space<smem>>, %arg2: memref<56xi32, #tpu.memory_space<smem>>) -> (i32, i32) {
    %c0_i32 = arith.constant 0 : i32
    %c0_i32_0 = arith.constant 0 : i32
    %c0_i32_1 = arith.constant 0 : i32
    return %c0_i32, %c0_i32_0 : i32, i32
  }
  func.func @transform_1(%arg0: i32, %arg1: memref<48xi32, #tpu.memory_space<smem>>, %arg2: memref<56xi32, #tpu.memory_space<smem>>) -> (i32, i32) {
    %c0_i32 = arith.constant 0 : i32
    %c0_i32_0 = arith.constant 0 : i32
    %c0_i32_1 = arith.constant 0 : i32
    return %c0_i32, %c0_i32_0 : i32, i32
  }
  func.func @transform_2(%arg0: i32, %arg1: memref<48xi32, #tpu.memory_space<smem>>, %arg2: memref<56xi32, #tpu.memory_space<smem>>) -> (i32, i32, i32) {
    %c0_i32 = arith.constant 0 : i32
    %c0_i32_0 = arith.constant 0 : i32
    %c0_i32_1 = arith.constant 0 : i32
    return %arg0, %c0_i32, %c0_i32_0 : i32, i32, i32
  }
  func.func @transform_3(%arg0: i32, %arg1: memref<48xi32, #tpu.memory_space<smem>>, %arg2: memref<56xi32, #tpu.memory_space<smem>>) -> (i32, i32, i32) {
    %c0_i32 = arith.constant 0 : i32
    %c0_i32_0 = arith.constant 0 : i32
    %c0_i32_1 = arith.constant 0 : i32
    return %arg0, %c0_i32, %c0_i32_0 : i32, i32, i32
  }
  func.func @transform_4(%arg0: i32, %arg1: memref<48xi32, #tpu.memory_space<smem>>, %arg2: memref<56xi32, #tpu.memory_space<smem>>) -> (i32, i32, i32) {
    %c0_i32 = arith.constant 0 : i32
    %c0_i32_0 = arith.constant 0 : i32
    %c0_i32_1 = arith.constant 0 : i32
    return %arg0, %c0_i32, %c0_i32_0 : i32, i32, i32
  }
  func.func @transform_5(%arg0: i32, %arg1: memref<48xi32, #tpu.memory_space<smem>>, %arg2: memref<56xi32, #tpu.memory_space<smem>>) -> (i32, i32, i32) {
    %c0_i32 = arith.constant 0 : i32
    %c0_i32_0 = arith.constant 0 : i32
    %c0_i32_1 = arith.constant 0 : i32
    return %arg0, %c0_i32, %c0_i32_0 : i32, i32, i32
  }
  func.func @transform_6(%arg0: i32, %arg1: memref<48xi32, #tpu.memory_space<smem>>, %arg2: memref<56xi32, #tpu.memory_space<smem>>) -> (i32, i32, i32) {
    %c0_i32 = arith.constant 0 : i32
    %c0_i32_0 = arith.constant 0 : i32
    %c0_i32_1 = arith.constant 0 : i32
    return %arg0, %c0_i32, %c0_i32_0 : i32, i32, i32
  }
  func.func @transform_7(%arg0: i32, %arg1: memref<48xi32, #tpu.memory_space<smem>>, %arg2: memref<56xi32, #tpu.memory_space<smem>>) -> (i32, i32, i32) {
    %c0_i32 = arith.constant 0 : i32
    %c0_i32_0 = arith.constant 0 : i32
    %c0_i32_1 = arith.constant 0 : i32
    return %arg0, %c0_i32, %c0_i32_0 : i32, i32, i32
  }
  func.func @transform_8(%arg0: i32, %arg1: memref<48xi32, #tpu.memory_space<smem>>, %arg2: memref<56xi32, #tpu.memory_space<smem>>) -> (i32, i32) {
    %c0_i32 = arith.constant 0 : i32
    %c0_i32_0 = arith.constant 0 : i32
    %c0_i32_1 = arith.constant 0 : i32
    return %c0_i32, %c0_i32_0 : i32, i32
  }
  func.func @transform_9(%arg0: i32, %arg1: memref<48xi32, #tpu.memory_space<smem>>, %arg2: memref<56xi32, #tpu.memory_space<smem>>) -> (i32, i32) {
    %c0_i32 = arith.constant 0 : i32
    %c0_i32_0 = arith.constant 0 : i32
    %c0_i32_1 = arith.constant 0 : i32
    return %c0_i32, %c0_i32_0 : i32, i32
  }
  func.func @transform_10(%arg0: i32, %arg1: memref<48xi32, #tpu.memory_space<smem>>, %arg2: memref<56xi32, #tpu.memory_space<smem>>) -> (i32, i32) {
    %c0_i32 = arith.constant 0 : i32
    %c0_i32_0 = arith.constant 0 : i32
    %c0_i32_1 = arith.constant 0 : i32
    return %c0_i32, %c0_i32_0 : i32, i32
  }
}

</mosaic_0001>

<bundles_post_ra>
// kernel: tpu_custom_call.1
= control target key start
LH: loop header
LB: loop body
LE: loop exit
PB: predicated region body
PF: predicated region fallthrough
CT: control target
= control target key end

     0   :  { %s3214_s0 = inlined_call_operand.hbm [shape: s32[48], index: 0, kind: input, shape index: {}]   ;;  %s3215_s2 = inlined_call_operand.hbm [shape: f32[16,128], index: 2, kind: input, shape index: {}]   ;;  %s3216_s3 = inlined_call_operand.hbm [shape: f32[48,128], index: 3, kind: input, shape index: {}]   ;;  %s3217_s4 = inlined_call_operand.hbm [shape: f32[2,128,128], index: 4, kind: input, shape index: {}]   ;;  %s3218_s5 = inlined_call_operand.hbm [shape: f32[2,128,128], index: 5, kind: input, shape index: {}]   ;;  %s3219_s6 = inlined_call_operand.vmem [shape: f32[2,1,128], index: 6, kind: input, shape index: {}]   ;;  %s3220_s7 = inlined_call_operand.hbm [shape: f32[2,128,128], index: 7, kind: input, shape index: {}]   ;;  %s3221_s8 = inlined_call_operand.hbm [shape: f32[2,128,128], index: 8, kind: input, shape index: {}]   ;;  %s3222_s9 = inlined_call_operand.vmem [shape: f32[2,1,128], index: 9, kind: input, shape index: {}]   ;;  %s3223_s10 = inlined_call_operand.hbm [shape: f32[128,128], index: 10, kind: input, shape index: {}]   ;;  %s3224_s11 = inlined_call_operand.vmem [shape: f32[1,128], index: 11, kind: input, shape index: {}]   ;;  %s3225_s12 = inlined_call_operand.hbm [shape: f32[16,128], index: 12, kind: output, shape index: {}]   ;;  %s3226_s1 = inlined_call_operand.vmem [shape: s32[56], index: 1, kind: input, shape index: {}]  }
   0x1   :  { %3244 = sst [smem:[#allocation30_spill]] %s3215_s2  ;;  %s2283_s23 = scalar_lea.hbm %s3214_s0, 16 }
   0x2   :  { %3245 = sst [smem:[#allocation31_spill]] %s3217_s4  ;;  %p2284_p0 = scmp.ne.s32.totalorder %s3214_s0, %s2283_s23 }
   0x3   :  { %3246 = sst [smem:[#allocation32_spill]] %s3219_s6  ;;  %p2287_p1 = scmp.lt.u32.totalorder %s2283_s23, %s3214_s0 }
   0x4   :  { %3247 = sst [smem:[#allocation33_spill]] %s3222_s9 }
   0x5   :  { %3248 = sst [smem:[#allocation34_spill]] %s3224_s11  ;;  %p2289_p2 = pnand %p2287_p1, %p2284_p0 }
   0x6   :  { %3249 = sst [smem:[#allocation35_spill]] %s3225_s12 }
   0x7   :  { %2292 = shalt.err (!%p2289_p2)  }
   0x8   :  { %s2597_s28 = smov [#allocation8]   ;;  %s19_s15 = sshll.u32 %s3226_s1, 4  ;;  %s20_s15 = int_to_ptr.vmem [resolvable:$true] %s19_s15 }
   0x9   :  { %18 = dma.hbm_to_smem %s3214_s0, 16, %s2597_s28, [#allocation7] }
   0xa   :  { %s2293_s16 = scalar_lea.vmem %s20_s15, 16  ;;  %p2298_p4 = scmp.lt.s32.totalorder %s20_s15, %s20_s15 }
   0xb   :  { %p2294_p3 = scmp.ne.s32.totalorder %s20_s15, %s2293_s16  ;;  %p2299_p5 = scmp.lt.s32.totalorder %s2293_s16, %s2293_s16 }
   0xd   :  { %p2300_p6 = por %p2299_p5, %p2298_p4 }
   0xf   :  { %p2301_p7 = pnand %p2300_p6, %p2294_p3 }
  0x11   :  { %2304 = shalt.err (!%p2301_p7)  }
  0x12   :  { %s2598_s17 = smov [#allocation9]  }
  0x13   :  { %22 = dma.vmem_to_smem %s20_s15, 16, %s2598_s17, [#allocation7] }
  0x14   :  { %2555 = dma.done.wait [#allocation7], 32 }
  0x15   :  { %2556 = vsyncadd [#allocation7], 4294967264 }
  0x16   :  { %24 = sfence }
  0x17   :  { %25 = vsyncpa [#allocation11], 0 }
  0x18   :  { %26 = vsyncpa [#allocation14], 0 }
  0x19   :  { %27 = vsyncpa [#allocation12], 0  ;;  %s2702_s0 = smov 0   ;;  %s2704_s18 = smov 0  }
  0x1a   :  { %s2706_s1 = smov 0   ;;  %s2708_s19 = smov 0  }
  0x1b LB: > { %3250 = sst [smem:[#allocation27_spill]] %s2587_s1  ;;  %s2721_s20 = sadd.s32 4294967295, %s2591_s19   ;;  %s2591_s19 = sphi %s2708_s19, %s3286_s19   ;;  %s2587_s1 = sphi %s2706_s1, %s3288_s1   ;;  %s2583_s18 = sphi %s2704_s18, %s3290_s18   ;;  %s2579_s0 = sphi %s2702_s0, %s3289_s0  }
  0x1c   : > { %s2724_s21 = sadd.s32 1, %s2591_s19   ;;  %s82_s23 = sadd.s32 1, %s2587_s1 }
  0x1d   : > { %3251 = sst [smem:[#allocation28_spill]] %s2724_s21  ;;  %s79_s22 = ssub.s32 %s2591_s19, %s2724_s21 }
  0x1e   : > { %p80_p8 = scmp.eq.s32.totalorder %s79_s22, 0  ;;  %p89_p9 = scmp.ne.s32.totalorder %s2587_s1, %s2583_s18 }
  0x1f   : > { %p90_p10 = scmp.eq.s32.totalorder %s2591_s19, 0  ;;  %p95_p11 = scmp.ne.s32.totalorder %s2583_s18, %s2579_s0 }
  0x20   : > { %s2734_s24 = scalar_select %p80_p8, %s2587_s1, %s82_s23  }
  0x21   : > { %p2736_p12 = por %p90_p10, %p89_p9  ;;  %p3227_p13 = scmp.eq.s32.totalorder %s2721_s20, 0 }
  0x22   : > { %3252 = sst [smem:[#allocation29_spill]] %s2734_s24  ;;  %p1616_p0 = scmp.ge.s32.totalorder %s2591_s19, 1 }
  0x23   : > { %p299_p1 = scmp.lt.s32.totalorder %s2591_s19, 3  ;;  %p2745_p2 = por %p3227_p13, %p95_p11 }
  0x24   : > { %s2599_s28 = smov [#allocation10]   ;;  %p2174_p7 = scmp.lt.s32.totalorder %s2591_s19, 2 }
  0x25   : > { %s3254_s26 = scalar_select %p2745_p2, 1, 0 }
  0x26   : > { %p2750_p4 = pnand %p1616_p0, %p299_p1  ;;  %s311_s29 = sshll.u32 %s2599_s28, 4  ;;  %s312_s29 = int_to_ptr.vmem [resolvable:$true] %s311_s29 }
  0x27   : > { %s356_s14 = sand.u32 1, %s2587_s1   ;;  %p2767_p8 = pnand %p2174_p7, %p2736_p12 }
  0x28   : > { %s3255_s27 = scalar_select %p2750_p4, 1, 0 }
  0x29   : > { %p2148_p5 = pneg %p2750_p4  ;;  %s3258_s2 = sld [smem:[#allocation30_spill]] }
  0x2a   : > { %s3257_s15 = scalar_select %p2767_p8, 1, 0 }
  0x2b   : > { %p2758_p6 = pnand %p2148_p5, %p3227_p13 }
  0x2d   : > { %s3256_s30 = scalar_select %p2758_p6, 1, 0 }
  0x2e   : > { %p2779_p10 = pneg %p2758_p6 }
  0x2f   : > { %s2305_s0 = scalar_lea.hbm %s3258_s2, 256 }
  0x30   : > { %p2306_p9 = scmp.ne.s32.totalorder %s3258_s2, %s2305_s0  ;;  %p2312_p0 = scmp.lt.u32.totalorder %s2305_s0, %s3258_s2 }
  0x31   : > { %s3259_s28 = scalar_select %p2779_p10, 1, 0 }
  0x32   : > { %p2308_p11 = pnand %p2779_p10, %p2306_p9 }
  0x34   : > { %p2309_p12 = pneg %p2308_p11 }
  0x36   : > { %p2314_p1 = pnand %p2312_p0, %p2309_p12 }
  0x38   : > { %2317 = shalt.err (!%p2314_p1)
}
  0x39   : > { %s2318_s16 = scalar_lea.vmem %s312_s29, 256  ;;  %p2326_p13 = scmp.lt.s32.totalorder %s312_s29, %s312_s29 }
  0x3a   : > { %p2319_p5 = scmp.ne.s32.totalorder %s312_s29, %s2318_s16  ;;  %p2327_p2 = scmp.lt.s32.totalorder %s2318_s16, %s2318_s16 }
  0x3c   : > { %p2321_p7 = pnand %p2319_p5, %p2779_p10  ;;  %p2328_p4 = por %p2327_p2, %p2326_p13 }
  0x3e   : > { %p2322_p3 = pneg %p2321_p7 }
  0x40   : > { %p2329_p8 = pnand %p2328_p4, %p2322_p3 }
  0x42   : > { %2332 = shalt.err (!%p2329_p8)
}
  0x43   : > { %s3235_s17 = smov 128   ;;  %s3237_s13 = smov 8  }
  0x44   : > { %2151 = dma.hbm_to_vmem [thread:$0]  (!%p2758_p6), %s3258_s2, 256, %s312_s29, [#allocation11], %s3235_s17, %s3235_s17, %s3237_s13  }
  0x45   : > { %s2798_s23 = sshll.u32 %s356_s14, 7  ;;  %s2801_s25 = sshll.u32 %s2591_s19, 11 }
  0x46   : > { %s3260_s4 = sld [smem:[#allocation31_spill]]  ;;  %s358_s21 = scalar_lea.vmem [#allocation15], %s2798_s23 }
  0x47   : > { %s365_s12 = sshll.u32 %s358_s21, 4  ;;  %s2816_s0 = scalar_lea.hbm %s3218_s5, %s2801_s25  ;;  %s2810_s12 = int_to_ptr.vmem [resolvable:$true] %s365_s12 }
  0x48   : > { %s3261_s22 = sand.u32 1, %s2591_s19   ;;  %p3262_p2 = scmp.ne.s32.totalorder %s3257_s15, 0 }
  0x49   : > { %s2820_s17 = scalar_lea.sflag [#allocation11], %s3261_s22 }
  0x4a   : > { %p2826_p3 = pneg %p3262_p2 }
  0x4c   : > { %s2807_s1 = scalar_lea.hbm %s3260_s4, %s2801_s25  ;;  %s2338_s29 = scalar_lea.hbm %s3260_s4, 4096 }
  0x4d   : > { %s2333_s24 = scalar_lea.hbm %s2807_s1, 2048  ;;  %p2339_p9 = scmp.lt.u32.totalorder %s2807_s1, %s3260_s4 }
  0x4e   : > { %p2334_p13 = scmp.ne.s32.totalorder %s2807_s1, %s2333_s24  ;;  %p2340_p11 = scmp.lt.u32.totalorder %s2338_s29, %s2333_s24 }
  0x4f   : > { %p2342_p0 = scmp.lt.u32.totalorder %s2333_s24, %s2807_s1 }
  0x50   : > { %p2336_p4 = pnand %p2826_p3, %p2334_p13  ;;  %p2341_p12 = por %p2340_p11, %p2339_p9 }
  0x52   : > { %p2337_p8 = pneg %p2336_p4  ;;  %p2343_p1 = por %p2342_p0, %p2341_p12 }
  0x54   : > { %p2344_p5 = pnand %p2343_p1, %p2337_p8 }
  0x56   : > { %2347 = shalt.err (!%p2344_p5)
}
  0x57   : > { %s2348_s19 = scalar_lea.vmem %s2810_s12, 2048  ;;  %s2602_s13 = smov [#allocation15]  }
  0x58   : > { %p2349_p7 = scmp.ne.s32.totalorder %s2810_s12, %s2348_s19  ;;  %s2353_s22 = sshll.u32 %s2602_s13, 4  ;;  %s2354_s22 = int_to_ptr.vmem [resolvable:$false] %s2353_s22 }
  0x59   : > { %s2355_s2 = scalar_lea.vmem %s2354_s22, 4096  ;;  %p2356_p6 = scmp.lt.s32.totalorder %s2810_s12, %s2354_s22 }
  0x5a   : > { %p2351_p13 = pnand %p2349_p7, %p2826_p3  ;;  %p2357_p10 = scmp.lt.s32.totalorder %s2355_s2, %s2348_s19 }
  0x5c   : > { %p2352_p4 = pneg %p2351_p13  ;;  %p2358_p9 = por %p2357_p10, %p2356_p6 }
  0x5e   : > { %p2359_p11 = pnand %p2358_p9, %p2352_p4 }
  0x60   : > { %2362 = shalt.err (!%p2359_p11)
}
  0x61   : > { %s3264_s24 = smov 8   ;;  %s3265_s21 = smov 128  }
  0x62   : > { %2161 = dma.hbm_to_vmem [thread:$0]  (!%p3262_p2), %s2807_s1, 2048, %s2810_s12, %s2820_s17, %s3265_s21, %s3265_s21, %s3264_s24  }
  0x63   : > { %s379_s29 = scalar_lea.vmem [#allocation16], %s2798_s23  ;;  %s2603_s19 = smov [#allocation13]  }
  0x64   : > { %s386_s14 = sshll.u32 %s379_s29, 4  ;;  %s2856_s13 = sshll.u32 %s2603_s19, 4  ;;  %s2854_s14 = int_to_ptr.vmem [resolvable:$true] %s386_s14  ;;  %s325_s13 = int_to_ptr.vmem [resolvable:$true] %s2856_s13 }
  0x65   : > { %s2363_s22 = scalar_lea.hbm %s2816_s0, 2048  ;;  %s2368_s11 = scalar_lea.hbm %s3218_s5, 4096 }
  0x66   : > { %p2364_p6 = scmp.ne.s32.totalorder %s2816_s0, %s2363_s22  ;;  %p2369_p12 = scmp.lt.u32.totalorder %s2816_s0, %s3218_s5 }
  0x67   : > { %p2370_p0 = scmp.lt.u32.totalorder %s2368_s11, %s2363_s22  ;;  %p2372_p5 = scmp.lt.u32.totalorder %s2363_s22, %s2816_s0 }
  0x68   : > { %p2366_p10 = pnand %p2364_p6, %p2826_p3 }
  0x69   : > { %p2371_p1 = por %p2370_p0, %p2369_p12 }
  0x6a   : > { %p2367_p8 = pneg %p2366_p10 }
  0x6b   : > { %p2373_p7 = por %p2372_p5, %p2371_p1 }
  0x6d   : > { %p2374_p13 = pnand %p2373_p7, %p2367_p8 }
  0x6f   : > { %2377 = shalt.err (!%p2374_p13)
}
  0x70   : > { %s2378_s12 = scalar_lea.vmem %s2854_s14, 2048  ;;  %s2604_s4 = smov [#allocation16]  }
  0x71   : > { %p2379_p4 = scmp.ne.s32.totalorder %s2854_s14, %s2378_s12  ;;  %s2383_s1 = sshll.u32 %s2604_s4, 4  ;;  %s2384_s1 = int_to_ptr.vmem [resolvable:$false] %s2383_s1 }
  0x72   : > { %s2385_s6 = scalar_lea.vmem %s2384_s1, 4096  ;;  %p2386_p6 = scmp.lt.s32.totalorder %s2854_s14, %s2384_s1 }
  0x73   : > { %p2381_p9 = pnand %p2379_p4, %p2826_p3  ;;  %p2387_p10 = scmp.lt.s32.totalorder %s2385_s6, %s2378_s12 }
  0x75   : > { %p2382_p11 = pneg %p2381_p9  ;;  %p2388_p12 = por %p2387_p10, %p2386_p6 }
  0x77   : > { %p2389_p0 = pnand %p2388_p12, %p2382_p11 }
  0x79   : > { %2392 = shalt.err (!%p2389_p0)
}
  0x7a   : > { %2164 = dma.hbm_to_vmem [thread:$0]  (!%p3262_p2), %s2816_s0, 2048, %s2854_s14, %s2820_s17, %s3265_s21, %s3265_s21, %s3264_s24  }
  0x7b   : > { %s2393_s29 = scalar_lea.hbm %s3216_s3, 768  ;;  %p3266_p1 = scmp.ne.s32.totalorder %s3259_s28, 0 }
  0x7c   : > { %p2394_p8 = scmp.ne.s32.totalorder %s3216_s3, %s2393_s29  ;;  %p2400_p13 = scmp.lt.u32.totalorder %s2393_s29, %s3216_s3 }
  0x7e   : > { %p2396_p5 = pnand %p2394_p8, %p3266_p1 }
  0x80   : > { %p2397_p7 = pneg %p2396_p5 }
  0x82   : > { %p2402_p4 = pnand %p2400_p13, %p2397_p7 }
  0x84   : > { %2405 = shalt.err (!%p2402_p4)
}
  0x85   : > { %s2406_s4 = scalar_lea.vmem %s325_s13, 768  ;;  %p2414_p10 = scmp.lt.s32.totalorder %s325_s13, %s325_s13 }
  0x86   : > { %p2407_p9 = scmp.ne.s32.totalorder %s325_s13, %s2406_s4  ;;  %p2415_p12 = scmp.lt.s32.totalorder %s2406_s4, %s2406_s4 }
  0x88   : > { %p2409_p11 = pnand %p2407_p9, %p3266_p1  ;;  %p2416_p0 = por %p2415_p12, %p2414_p10 }
  0x8a   : > { %p2410_p6 = pneg %p2409_p11 }
  0x8c   : > { %p2417_p2 = pnand %p2416_p0, %p2410_p6 }
  0x8e   : > { %2420 = shalt.err (!%p2417_p2)
}
  0x8f   : > { %p3267_p8 = scmp.ne.s32.totalorder %s3256_s30, 0  ;;  %s2909_s9 = scalar_lea.hbm %s3220_s7, %s2801_s25 }
  0x90   : > { %s406_s11 = scalar_lea.vmem [#allocation17], %s2798_s23  ;;  %s2421_s19 = scalar_lea.hbm %s2909_s9, 2048 }
  0x91   : > { %2154 = dma.hbm_to_vmem [thread:$0]  (!%p3267_p8), %s3216_s3, 768, %s325_s13, [#allocation14], %s3265_s21, %s3265_s21, %s3264_s24  }
  0x92   : > { %s413_s29 = sshll.u32 %s406_s11, 4  ;;  %p2422_p2 = scmp.ne.s32.totalorder %s2909_s9, %s2421_s19  ;;  %s2912_s29 = int_to_ptr.vmem [resolvable:$true] %s413_s29 }
  0x93   : > { %s2426_s2 = scalar_lea.hbm %s3220_s7, 4096  ;;  %p2427_p13 = scmp.lt.u32.totalorder %s2909_s9, %s3220_s7 }
  0x94   : > { %p2424_p5 = pnand %p2422_p2, %p2826_p3  ;;  %p2428_p4 = scmp.lt.u32.totalorder %s2426_s2, %s2421_s19 }
  0x95   : > { %p2430_p11 = scmp.lt.u32.totalorder %s2421_s19, %s2909_s9 }
  0x96   : > { %p2425_p7 = pneg %p2424_p5  ;;  %p2429_p9 = por %p2428_p4, %p2427_p13 }
  0x98   : > { %p2431_p6 = por %p2430_p11, %p2429_p9 }
  0x9a   : > { %p2432_p10 = pnand %p2431_p6, %p2425_p7 }
  0x9c   : > { %2435 = shalt.err (!%p2432_p10)
}
  0x9d   : > { %s2436_s0 = scalar_lea.vmem %s2912_s29, 2048  ;;  %s2605_s14 = smov [#allocation17]  }
  0x9e   : > { %p2437_p12 = scmp.ne.s32.totalorder %s2912_s29, %s2436_s0  ;;  %s2441_s1 = sshll.u32 %s2605_s14, 4  ;;  %s2442_s1 = int_to_ptr.vmem [resolvable:$false] %s2441_s1 }
  0x9f   : > { %s2443_s6 = scalar_lea.vmem %s2442_s1, 4096  ;;  %p2444_p5 = scmp.lt.s32.totalorder %s2912_s29, %s2442_s1 }
  0xa0   : > { %p2439_p0 = pnand %p2437_p12, %p2826_p3  ;;  %p2445_p8 = scmp.lt.s32.totalorder %s2443_s6, %s2436_s0 }
  0xa2   : > { %p2440_p2 = pneg %p2439_p0  ;;  %p2446_p13 = por %p2445_p8, %p2444_p5 }
  0xa4   : > { %p2447_p4 = pnand %p2446_p13, %p2440_p2 }
  0xa6   : > { %2450 = shalt.err (!%p2447_p4)
}
  0xa7   : > { %p3268_p7 = scmp.ne.s32.totalorder %s3257_s15, 0  ;;  %s2606_s11 = smov [#allocation19]  }
  0xa8   : > { %s337_s19 = sshll.u32 %s2606_s11, 4  ;;  %s2943_s2 = scalar_lea.hbm %s3221_s8, %s2801_s25  ;;  %s338_s19 = int_to_ptr.vmem [resolvable:$true] %s337_s19 }
  0xa9   : > { %2167 = dma.hbm_to_vmem [thread:$0]  (!%p3268_p7), %s2909_s9, 2048, %s2912_s29, %s2820_s17, %s3265_s21, %s3265_s21, %s3264_s24  }
  0xaa   : > { %s2451_s0 = scalar_lea.hbm %s3223_s10, 2048 }
  0xab   : > { %p2452_p8 = scmp.ne.s32.totalorder %s3223_s10, %s2451_s0  ;;  %p2458_p6 = scmp.lt.u32.totalorder %s2451_s0, %s3223_s10 }
  0xad   : > { %p2454_p9 = pnand %p2452_p8, %p3266_p1 }
  0xaf   : > { %p2455_p11 = pneg %p2454_p9 }
  0xb1   : > { %p2460_p10 = pnand %p2458_p6, %p2455_p11 }
  0xb3   : > { %2463 = shalt.err (!%p2460_p10)
}
  0xb4   : > { %s2464_s6 = scalar_lea.vmem %s338_s19, 2048  ;;  %p2472_p5 = scmp.lt.s32.totalorder %s338_s19, %s338_s19 }
  0xb5   : > { %p2465_p12 = scmp.ne.s32.totalorder %s338_s19, %s2464_s6  ;;  %p2473_p13 = scmp.lt.s32.totalorder %s2464_s6, %s2464_s6 }
  0xb7   : > { %p2467_p0 = pnand %p2465_p12, %p3266_p1  ;;  %p2474_p4 = por %p2473_p13, %p2472_p5 }
  0xb9   : > { %p2468_p2 = pneg %p2467_p0 }
  0xbb   : > { %p2475_p7 = pnand %p2474_p4, %p2468_p2 }
  0xbd   : > { %2478 = shalt.err (!%p2475_p7)
}
  0xbe   : > { %p3269_p8 = scmp.ne.s32.totalorder %s3256_s30, 0  ;;  %s427_s28 = scalar_lea.vmem [#allocation18], %s2798_s23 }
  0xbf   : > { %s434_s22 = sshll.u32 %s427_s28, 4  ;;  %s2479_s13 = scalar_lea.hbm %s2943_s2, 2048  ;;  %s2967_s22 = int_to_ptr.vmem [resolvable:$true] %s434_s22 }
  0xc0   : > { %2157 = dma.hbm_to_vmem [thread:$0]  (!%p3269_p8), %s3223_s10, 2048, %s338_s19, [#allocation14], %s3265_s21, %s3265_s21, %s3264_s24  }
  0xc1   : > { %p2480_p1 = scmp.ne.s32.totalorder %s2943_s2, %s2479_s13  ;;  %s2484_s4 = scalar_lea.hbm %s3221_s8, 4096 }
  0xc2   : > { %p2485_p11 = scmp.lt.u32.totalorder %s2943_s2, %s3221_s8  ;;  %p2486_p6 = scmp.lt.u32.totalorder %s2484_s4, %s2479_s13 }
  0xc3   : > { %p2482_p7 = pnand %p2480_p1, %p2826_p3  ;;  %p2488_p12 = scmp.lt.u32.totalorder %s2479_s13, %s2943_s2 }
  0xc4   : > { %p2487_p10 = por %p2486_p6, %p2485_p11 }
  0xc5   : > { %p2483_p9 = pneg %p2482_p7 }
  0xc6   : > { %p2489_p0 = por %p2488_p12, %p2487_p10 }
  0xc8   : > { %p2490_p2 = pnand %p2489_p0, %p2483_p9 }
  0xca   : > { %2493 = shalt.err (!%p2490_p2)
}
  0xcb   : > { %s2494_s23 = scalar_lea.vmem %s2967_s22, 2048  ;;  %s2607_s19 = smov [#allocation18]  }
  0xcc   : > { %p2495_p5 = scmp.ne.s32.totalorder %s2967_s22, %s2494_s23  ;;  %s2499_s1 = sshll.u32 %s2607_s19, 4  ;;  %s2500_s1 = int_to_ptr.vmem [resolvable:$false] %s2499_s1 }
  0xcd   : > { %s2501_s9 = scalar_lea.vmem %s2500_s1, 4096  ;;  %p2502_p8 = scmp.lt.s32.totalorder %s2967_s22, %s2500_s1 }
  0xce   : > { %p2497_p13 = pnand %p2495_p5, %p2826_p3  ;;  %p2503_p1 = scmp.lt.s32.totalorder %s2501_s9, %s2494_s23 }
  0xd0   : > { %p2498_p4 = pneg %p2497_p13  ;;  %p2504_p7 = por %p2503_p1, %p2502_p8 }
  0xd2   : > { %p2505_p11 = pnand %p2504_p7, %p2498_p4 }
  0xd4   : > { %2508 = shalt.err (!%p2505_p11)
}
  0xd5   : > { %p3270_p9 = scmp.ne.s32.totalorder %s3257_s15, 0  ;;  %p3271_p3 = scmp.ne.s32.totalorder %s3255_s27, 0 }
  0xd6   : > { %p3272_p6 = scmp.eq.s32.totalorder (!%p3271_p3), %s2721_s20, 0 }
  0xd7   : > { %2170 = dma.hbm_to_vmem [thread:$0]  (!%p3270_p9), %s2943_s2, 2048, %s2967_s22, %s2820_s17, %s3265_s21, %s3265_s21, %s3264_s24  }
  0xd8   : > { %452 = sbr.rel (%p3271_p3) target bundleno = 1519 (0x5ef), region = 60 }
  0xdf   : > { %2558 = dma.done.wait (%p3272_p6), [#allocation11], 256   ;;  %p3273_p10 = pmov %p3272_p6 }
  0xe0   : > { %p3274_p12 = pmov %p3272_p6 }
  0xe1   : > { %2560 = vsyncadd (%p3273_p10), [#allocation11], 4294967040 }
  0xe2   : > { %2562 = dma.done.wait (%p3274_p12), [#allocation14], 768   ;;  %p3275_p0 = pmov %p3272_p6 }
  0xe3   : > { %s462_s15 = sand.u32 1, %s2721_s20   ;;  %s464_s17 = sand.u32 1, %s2583_s18  }
  0xe4   : > { %2564 = vsyncadd (%p3275_p0), [#allocation14], 4294966528  ;;  %s1636_s16 = sshll.u32 %s464_s17, 7  ;;  %s463_s27 = scalar_lea.sflag [#allocation11], %s462_s15 }
  0xe5   : > { %s3006_s24 = scalar_lea.vmem [#allocation15], %s1636_s16  ;;  %p3276_p2 = scmp.ne.s32.totalorder %s3254_s26, 0 }
  0xe7   : > { %2566 = dma.done.wait (%p3276_p2), %s463_s27, 8192  }
  0xe8   : > { %2568 = vsyncadd (%p3276_p2), %s463_s27, 4294959104  ;;  %s3012_s21 = scalar_lea.vmem [#allocation16], %s1636_s16  ;;  %s3014_s2 = scalar_lea.vmem [#allocation17], %s1636_s16 }
  0xe9   : > { %s3016_s29 = scalar_lea.vmem [#allocation18], %s1636_s16  ;;  %p3277_p5 = pmov %p3275_p0 }
  0xea   : > { %p3278_p13 = pmov %p3275_p0 }
  0xeb   : > { %2570 = dma.done.wait (%p3277_p5), [#allocation14], 2048  }
  0xec   : > { %2572 = vsyncadd (%p3278_p13), [#allocation14], 4294965248  ;;  %p550_p4 = scmp.lt.s32.totalorder %s2721_s20, 1  ;;  %s3279_s11 = sld [smem:[#allocation32_spill]] }
  0xed   : > { %s3280_s30 = sld [smem:[#allocation33_spill]]  ;;  %p3281_p8 = scmp.ne.s32.totalorder %s2721_s20, 0 }
  0xee   : > { %s3024_s6 = scalar_select %p550_p4, %s2721_s20, 1 }
  0xef   : > { %559 = sbr.rel (%p3281_p8) target bundleno = 246 (0xf6), region = 92  ;;  %v560_v0 = vld [vmem:[#allocation10] sm:$0xff] (!%p3281_p8)  ;;  %v561_v1 = vld [vmem:[#allocation10 + $0x8] sm:$0xff] (!%p3281_p8)  ;;  %v2608_v2 = vmov (!%p3281_p8), 0.0  }
  0xf0   : > { %562 = vst [vmem:[#allocation2] sm:$0xff] (!%p3281_p8), %v560_v0  ;;  %563 = vst [vmem:[#allocation2 + $0x8] sm:$0xff] (!%p3281_p8), %v561_v1 }
  0xf1   : > { %564 = vst [vmem:[#allocation5] sm:$0xff] (!%p3281_p8), %v2608_v2  ;;  %565 = vst [vmem:[#allocation5 + $0x8] sm:$0xff] (!%p3281_p8), %v2608_v2 }
  0xf2   : > { %s552_s28 = scalar_lea.vmem %s3279_s11, %s3024_s6 }
  0xf3   : > { %s555_s12 = scalar_lea.vmem %s3280_s30, %s3024_s6 }
  0xf6 PF: > { %v572_v3 = vld [vmem:[%s3006_s24] sm:$0xff]  ;;  %v573_v4 = vld [vmem:[%s3006_s24 + $0x8] sm:$0xff]  ;;  %v574_v5 = vld [vmem:[%s3006_s24 + $0x10] sm:$0xff]  ;;  %s3119_s23 = smov 0  }
  0xf7   : > { %v1964_v6 = vpack.c.bf16 %v573_v4, %v572_v3  ;;  %v575_v7 = vld [vmem:[%s3006_s24 + $0x18] sm:$0xff]  ;;  %v576_v9 = vld [vmem:[%s3006_s24 + $0x20] sm:$0xff]  ;;  %v577_v10 = vld [vmem:[%s3006_s24 + $0x28] sm:$0xff] }
  0xf8   : > { %v1968_v8 = vpack.c.bf16 %v575_v7, %v574_v5  ;;  %v1972_v11 = vpack.c.bf16 %v577_v10, %v576_v9  ;;  %v3042_v12 = vld [vmem:[#allocation13] sm:$0xff]  ;;  %v579_v14 = vld [vmem:[%s3006_s24 + $0x38] sm:$0xff]  ;;  %v580_v16 = vld [vmem:[%s3006_s24 + $0x40] sm:$0xff] }
  0xf9   : > { %1965 = vmatprep.subr.bf16.mxu0 %v1964_v6  ;;  %v578_v13 = vld [vmem:[%s3006_s24 + $0x30] sm:$0xff]  ;;  %1809 = vmatprep.mubr.f32.mxu0 %v3042_v12  ;;  %v581_v17 = vld [vmem:[%s3006_s24 + $0x48] sm:$0xff]  ;;  %v583_v20 = vld [vmem:[%s3006_s24 + $0x58] sm:$0xff] }
  0xfa   : > { %1967 = vmatpush3.bf16.msra.mxu0 %v1964_v6  ;;  %v1976_v15 = vpack.c.bf16 %v579_v14, %v578_v13  ;;  %v1980_v18 = vpack.c.bf16 %v581_v17, %v580_v16  ;;  %v582_v19 = vld [vmem:[%s3006_s24 + $0x50] sm:$0xff]  ;;  %v584_v22 = vld [vmem:[%s3006_s24 + $0x60] sm:$0xff]  ;;  %v585_v23 = vld [vmem:[%s3006_s24 + $0x68] sm:$0xff] }
  0xfb   : > { %1969 = vmatprep.subr.bf16.mxu0 %v1968_v8  ;;  %v1984_v21 = vpack.c.bf16 %v583_v20, %v582_v19  ;;  %v1988_v24 = vpack.c.bf16 %v585_v23, %v584_v22  ;;  %v586_v25 = vld [vmem:[%s3006_s24 + $0x70] sm:$0xff]  ;;  %v587_v26 = vld [vmem:[%s3006_s24 + $0x78] sm:$0xff]  ;;  %v3057_v29 = vld [vmem:[#allocation13 + $0x10] sm:$0xff]  ;;  %v2609_v20 = vmov 16  }
  0xfc   : > { %v1992_v27 = vpack.c.bf16 %v587_v26, %v586_v25  ;;  %v3055_v28 = vld [vmem:[#allocation13 + $0x8] sm:$0xff]  ;;  %v3061_v30 = vld [vmem:[#allocation13 + $0x18] sm:$0xff]  ;;  %v3063_v31 = vld [vmem:[#allocation13 + $0x20] sm:$0xff]  ;;  %2242 = vset.pattern.permute.xlu1 %v2609_v20  ;;  %2241 = vset.pattern.permute.xlu0 %v2609_v20 }
  0xfd   : > { %v3067_v32 = vld [vmem:[#allocation13 + $0x28] sm:$0xff]  ;;  %v737_v33 = vld [vmem:[%s3012_s21] sm:$0xff]  ;;  %v738_v34 = vld [vmem:[%s3012_s21 + $0x8] sm:$0xff]  ;;  %867 = vperm.xlu1 %2242, %v3057_v29   ;;  %857 = vperm.xlu0 %2241, %v3042_v12  }
  0xfe   : > { %1971 = vmatpush3.bf16.msra.mxu0 %v1968_v8  ;;  %v1996_v35 = vpack.c.bf16 %v738_v34, %v737_v33  ;;  %v739_v36 = vld [vmem:[%s3012_s21 + $0x10] sm:$0xff]  ;;  %v740_v37 = vld [vmem:[%s3012_s21 + $0x18] sm:$0xff]  ;;  %v741_v39 = vld [vmem:[%s3012_s21 + $0x20] sm:$0xff] }
  0xff   : > { %1973 = vmatprep.subr.bf16.mxu0 %v1972_v11  ;;  %v2000_v38 = vpack.c.bf16 %v740_v37, %v739_v36  ;;  %v742_v40 = vld [vmem:[%s3012_s21 + $0x28] sm:$0xff]  ;;  %v899_v42 = vld [vmem:[%s3014_s2] sm:$0xff]  ;;  %v743_v45 = vld [vmem:[%s3012_s21 + $0x30] sm:$0xff] }
 0x100   : > { %1997 = vmatprep.subr.bf16.mxu1 %v1996_v35  ;;  %v2004_v41 = vpack.c.bf16 %v742_v40, %v741_v39  ;;  %v900_v43 = vld [vmem:[%s3014_s2 + $0x8] sm:$0xff]  ;;  %v744_v46 = vld [vmem:[%s3012_s21 + $0x38] sm:$0xff]  ;;  %v901_v48 = vld [vmem:[%s3014_s2 + $0x10] sm:$0xff] }
 0x101   : > { %1999 = vmatpush3.bf16.msra.mxu1 %v1996_v35  ;;  %v2028_v44 = vpack.c.bf16 %v900_v43, %v899_v42  ;;  %v2008_v47 = vpack.c.bf16 %v744_v46, %v743_v45  ;;  %v902_v49 = vld [vmem:[%s3014_s2 + $0x18] sm:$0xff]  ;;  %v745_v51 = vld [vmem:[%s3012_s21 + $0x40] sm:$0xff]  ;;  %v746_v52 = vld [vmem:[%s3012_s21 + $0x48] sm:$0xff]  ;;  %872 = vperm.xlu1 %2242, %v3061_v30  }
 0x102   : > { %1975 = vmatpush3.bf16.msra.mxu0 %v1972_v11  ;;  %2001 = vmatprep.subr.bf16.mxu1 %v2000_v38  ;;  %v2032_v50 = vpack.c.bf16 %v902_v49, %v901_v48  ;;  %v2012_v53 = vpack.c.bf16 %v746_v52, %v745_v51  ;;  %v903_v54 = vld [vmem:[%s3014_s2 + $0x20] sm:$0xff]  ;;  %v904_v55 = vld [vmem:[%s3014_s2 + $0x28] sm:$0xff]  ;;  %v747_v57 = vld [vmem:[%s3012_s21 + $0x50] sm:$0xff] }
 0x103   : > { %1977 = vmatprep.subr.bf16.mxu0 %v1976_v15  ;;  %v2036_v56 = vpack.c.bf16 %v904_v55, %v903_v54  ;;  %v748_v58 = vld [vmem:[%s3012_s21 + $0x58] sm:$0xff]  ;;  %v905_v60 = vld [vmem:[%s3014_s2 + $0x30] sm:$0xff]  ;;  %v749_v63 = vld [vmem:[%s3012_s21 + $0x60] sm:$0xff]  ;;  %862 = vperm.xlu0 %2241, %v3055_v28  }
 0x104   : > { %v2016_v59 = vpack.c.bf16 %v748_v58, %v747_v57  ;;  %v906_v61 = vld [vmem:[%s3014_s2 + $0x38] sm:$0xff]  ;;  %v750_v0 = vld [vmem:[%s3012_s21 + $0x68] sm:$0xff]  ;;  %v907_v2 = vld [vmem:[%s3014_s2 + $0x40] sm:$0xff] }
 0x105   : > { %2003 = vmatpush3.bf16.msra.mxu1 %v2000_v38  ;;  %v2040_v62 = vpack.c.bf16 %v906_v61, %v905_v60  ;;  %v2020_v1 = vpack.c.bf16 %v750_v0, %v749_v63  ;;  %v908_v3 = vld [vmem:[%s3014_s2 + $0x48] sm:$0xff]  ;;  %v751_v5 = vld [vmem:[%s3012_s21 + $0x70] sm:$0xff]  ;;  %v752_v6 = vld [vmem:[%s3012_s21 + $0x78] sm:$0xff]  ;;  %882 = vperm.xlu1 %2242, %v3067_v32  }
 0x106   : > { %1979 = vmatpush3.bf16.msra.mxu0 %v1976_v15  ;;  %2005 = vmatprep.subr.bf16.mxu1 %v2004_v41  ;;  %v2044_v4 = vpack.c.bf16 %v908_v3, %v907_v2  ;;  %v2024_v7 = vpack.c.bf16 %v752_v6, %v751_v5  ;;  %v909_v8 = vld [vmem:[%s3014_s2 + $0x50] sm:$0xff]  ;;  %v910_v9 = vld [vmem:[%s3014_s2 + $0x58] sm:$0xff]  ;;  %v911_v11 = vld [vmem:[%s3014_s2 + $0x60] sm:$0xff] }
 0x107   : > { %1981 = vmatprep.subr.bf16.mxu0 %v1980_v18  ;;  %v2048_v10 = vpack.c.bf16 %v910_v9, %v909_v8  ;;  %v912_v13 = vld [vmem:[%s3014_s2 + $0x68] sm:$0xff]  ;;  %v913_v15 = vld [vmem:[%s3014_s2 + $0x70] sm:$0xff]  ;;  %v914_v16 = vld [vmem:[%s3014_s2 + $0x78] sm:$0xff]  ;;  %877 = vperm.xlu0 %2241, %v3063_v31  }
 0x108   : > { %v2052_v14 = vpack.c.bf16 %v912_v13, %v911_v11  ;;  %v2056_v17 = vpack.c.bf16 %v914_v16, %v913_v15  ;;  %v3104_v19 = vld [vmem:[#allocation2 + $0x8] sm:$0xff] }
 0x109   : > { %2007 = vmatpush3.bf16.msra.mxu1 %v2004_v41 }
 0x10a   : > { %1983 = vmatpush3.bf16.msra.mxu0 %v1980_v18  ;;  %2009 = vmatprep.subr.bf16.mxu1 %v2008_v47  ;;  %v3102_v18 = vld [vmem:[#allocation2] sm:$0xff] }
 0x10b   : > { %1985 = vmatprep.subr.bf16.mxu0 %v1984_v21 }
 0x10d   : > { %2011 = vmatpush3.bf16.msra.mxu1 %v2008_v47 }
 0x10e   : > { %1987 = vmatpush3.bf16.msra.mxu0 %v1984_v21  ;;  %2013 = vmatprep.subr.bf16.mxu1 %v2012_v53 }
 0x10f   : > { %1989 = vmatprep.subr.bf16.mxu0 %v1988_v24 }
 0x111   : > { %2015 = vmatpush3.bf16.msra.mxu1 %v2012_v53 }
 0x112   : > { %1991 = vmatpush3.bf16.msra.mxu0 %v1988_v24  ;;  %2017 = vmatprep.subr.bf16.mxu1 %v2016_v59 }
 0x113   : > { %1993 = vmatprep.subr.bf16.mxu0 %v1992_v27 }
 0x115   : > { %2019 = vmatpush3.bf16.msra.mxu1 %v2016_v59 }
 0x116   : > { %1995 = vmatpush3.bf16.msra.mxu0 %v1992_v27  ;;  %2021 = vmatprep.subr.bf16.mxu1 %v2020_v1 }
 0x117   : > { %2029 = vmatprep.subr.bf16.mxu0 %v2028_v44 }
 0x119   : > { %1810 = vmatmul.mubr.f32.vlgmr.msra.gmra.mrb[0].mxu0 %v3055_v28  ;;  %2023 = vmatpush3.bf16.msra.mxu1 %v2020_v1 }
 0x11a   : > { %1812 = vmatprep.mubr.f32.mxu0 %v3057_v29  ;;  %2031 = vmatpush3.bf16.msra.mxu0 %v2028_v44 }
 0x11b   : > { %2033 = vmatprep.subr.bf16.mxu0 %v2032_v50  ;;  %2025 = vmatprep.subr.bf16.mxu1 %v2024_v7 }
 0x11d   : > { %1813 = vmatmul.mubr.f32.gmra.mrb[2].mxu0 %v3061_v30  ;;  %2027 = vmatpush3.bf16.msra.mxu1 %v2024_v7 }
 0x11e   : > { %1815 = vmatprep.mubr.f32.mxu0 %v3063_v31  ;;  %2035 = vmatpush3.bf16.msra.mxu0 %v2032_v50 }
 0x11f   : > { %2037 = vmatprep.subr.bf16.mxu0 %v2036_v56 }
 0x121   : > { %1816 = vmatmul.mubr.f32.gmra.mrb[4].mxu0 %v3067_v32 }
 0x122   : > { %2039 = vmatpush3.bf16.msra.mxu0 %v2036_v56  ;;  %1891 = vmatprep.mubr.f32.mxu0 %v3102_v18 }
 0x123   : > { %2041 = vmatprep.subr.bf16.mxu0 %v2040_v62 }
 0x126   : > { %2043 = vmatpush3.bf16.msra.mxu0 %v2040_v62 }
 0x127   : > { %2045 = vmatprep.subr.bf16.mxu0 %v2044_v4 }
 0x12a   : > { %2047 = vmatpush3.bf16.msra.mxu0 %v2044_v4 }
 0x12b   : > { %2049 = vmatprep.subr.bf16.mxu0 %v2048_v10 }
 0x12e   : > { %2051 = vmatpush3.bf16.msra.mxu0 %v2048_v10 }
 0x12f   : > { %2053 = vmatprep.subr.bf16.mxu0 %v2052_v14 }
 0x132   : > { %2055 = vmatpush3.bf16.msra.mxu0 %v2052_v14 }
 0x133   : > { %2057 = vmatprep.subr.bf16.mxu0 %v2056_v17 }
 0x136   : > { %2059 = vmatpush3.bf16.msra.mxu0 %v2056_v17 }
 0x139   : > { %1892 = vmatmul.mubr.f32.vlgmr.msra.gmra.mrb[6].mxu0 %v3104_v19 }
 0x1ec   : > { %v1811_v21 = vpop.f32.mrb[0].mxu0 }
 0x1ed   : > { %v690_v22 = vand.u32 2147483647, %v1811_v21  ;;  %v654_v23 = vpop.f32.mrb[1].mxu0  ;;  %v684_v61 = vmax.f32 %v1811_v21, 0.0  ;;  %v2610_v21 = vmov 0.0  }
 0x1ee   : > { %v689_v24 = vand.u32 2147483647, %v654_v23  ;;  %v683_v59 = vmax.f32 %v654_v23, 0.0  ;;  %992 = vst [vmem:[#allocation6] sm:$0x1] %v2610_v21  ;;  %v868_v23 = vpop.permute.xlu1 %867 }
 0x1ef   : > { %v696_v25 = vsub.f32 0.0, %v690_v22  ;;  %v858_v22 = vpop.permute.xlu0 %857 }
 0x1f0   : > { %v695_v26 = vsub.f32 0.0, %v689_v24  ;;  %v1814_v27 = vpop.f32.mrb[2].mxu0  ;;  %v1642_v24 = vld [vmem:[%s552_s28] ss:$0 sm:$0xff] }
 0x1f1   : > { %v703_v29 = vmul.f32 1.442695, %v696_v25  ;;  %v692_v33 = vand.u32 2147483647, %v1814_v27  ;;  %v664_v34 = vpop.f32.mrb[3].mxu0  ;;  %v686_v5 = vmax.f32 %v1814_v27, 0.0 }
 0x1f2   : > { %v701_v35 = vmul.f32 1.442695, %v695_v26  ;;  %v691_v12 = vand.u32 2147483647, %v664_v34  ;;  %v685_v3 = vmax.f32 %v664_v34, 0.0 }
 0x1f3   : > { %2243 = vpow2.f32 %v703_v29  ;;  %v698_v30 = vsub.f32 0.0, %v692_v33  ;;  %v863_v29 = vpop.permute.xlu0 %862 }
 0x1f4   : > { %2245 = vpow2.f32 %v701_v35  ;;  %v697_v28 = vsub.f32 0.0, %v691_v12  ;;  %v1817_v36 = vpop.f32.mrb[4].mxu0  ;;  %v873_v35 = vpop.permute.xlu1 %872 }
 0x1f5   : > { %v707_v32 = vmul.f32 1.442695, %v698_v30  ;;  %v694_v37 = vand.u32 2147483647, %v1817_v36  ;;  %v674_v31 = vpop.f32.mrb[5].mxu0  ;;  %v688_v14 = vmax.f32 %v1817_v36, 0.0 }
 0x1f6   : > { %v705_v38 = vmul.f32 1.442695, %v697_v28  ;;  %v693_v39 = vand.u32 2147483647, %v674_v31  ;;  %v687_v11 = vmax.f32 %v674_v31, 0.0 }
 0x1f7   : > { %2247 = vpow2.f32 %v707_v32  ;;  %v700_v40 = vsub.f32 0.0, %v694_v37 }
 0x1f8   : > { %2249 = vpow2.f32 %v705_v38  ;;  %v699_v41 = vsub.f32 0.0, %v693_v39 }
 0x1f9   : > { %v711_v42 = vmul.f32 1.442695, %v700_v40 }
 0x1fa   : > { %v709_v43 = vmul.f32 1.442695, %v699_v41  ;;  %v883_v41 = vpop.permute.xlu1 %882 }
 0x1fb   : > { %2251 = vpow2.f32 %v711_v42 }
 0x1fc   : > { %2253 = vpow2.f32 %v709_v43  ;;  %v878_v43 = vpop.permute.xlu0 %877 }
 0x1fd   : > { %v2244_v44 = vpop.eup %2243 }
 0x1fe   : > { %v2246_v45 = vpop.eup %2245  ;;  %v714_v46 = vadd.f32 1.0, %v2244_v44 }
 0x1ff   : > { %v713_v47 = vadd.f32 1.0, %v2246_v45 }
 0x200   : > { %2255 = vlog2.f32 %v714_v46 }
 0x201   : > { %v2248_v48 = vpop.eup %2247  ;;  %2257 = vlog2.f32 %v713_v47 }
 0x202   : > { %v2250_v49 = vpop.eup %2249  ;;  %v716_v50 = vadd.f32 1.0, %v2248_v48 }
 0x203   : > { %v715_v51 = vadd.f32 1.0, %v2250_v49 }
 0x204   : > { %2259 = vlog2.f32 %v716_v50 }
 0x205   : > { %v2252_v52 = vpop.eup %2251  ;;  %2261 = vlog2.f32 %v715_v51 }
 0x206   : > { %v2254_v53 = vpop.eup %2253  ;;  %v718_v54 = vadd.f32 1.0, %v2252_v52 }
 0x207   : > { %v717_v55 = vadd.f32 1.0, %v2254_v53 }
 0x208   : > { %2263 = vlog2.f32 %v718_v54 }
 0x209   : > { %2265 = vlog2.f32 %v717_v55 }
 0x20a   : > { %v2256_v56 = vpop.eup %2255 }
 0x20b   : > { %v2258_v57 = vpop.eup %2257  ;;  %v722_v58 = vmul.f32 0.6931472, %v2256_v56 }
 0x20c   : > { %v720_v60 = vmul.f32 0.6931472, %v2258_v57  ;;  %v1893_v17 = vpop.f32.mrb[6].mxu0 }
 0x20d   : > { %v732_v1 = vadd.f32 %v722_v58, %v684_v61  ;;  %991 = vst [vmem:[#allocation3 + $0x8] sm:$0xff] %v1893_v17  ;;  %v981_v20 = vpop.f32.mrb[7].mxu0 }
 0x20e   : > { %v2260_v62 = vpop.eup %2259  ;;  %v731_v63 = vadd.f32 %v720_v60, %v683_v59  ;;  %990 = vst [vmem:[#allocation3] sm:$0xff] %v981_v20 }
 0x20f   : > { %v2262_v0 = vpop.eup %2261  ;;  %v726_v2 = vmul.f32 0.6931472, %v2260_v62 }
 0x210   : > { %v724_v4 = vmul.f32 0.6931472, %v2262_v0  ;;  %1850 = vmatprep.mubr.f32.mxu1 %v731_v63 }
 0x211   : > { %1851 = vmatmul.mubr.f32.vlgmr.msra.gmra.mrb[0].mxu1 %v732_v1  ;;  %v734_v9 = vadd.f32 %v726_v2, %v686_v5 }
 0x212   : > { %v2264_v6 = vpop.eup %2263  ;;  %v733_v7 = vadd.f32 %v724_v4, %v685_v3 }
 0x213   : > { %v2266_v8 = vpop.eup %2265  ;;  %v730_v10 = vmul.f32 0.6931472, %v2264_v6 }
 0x214   : > { %v728_v13 = vmul.f32 0.6931472, %v2266_v8  ;;  %1853 = vmatprep.mubr.f32.mxu1 %v733_v7 }
 0x215   : > { %1854 = vmatmul.mubr.f32.gmra.mrb[2].mxu1 %v734_v9  ;;  %v736_v16 = vadd.f32 %v730_v10, %v688_v14 }
 0x216   : > { %v735_v15 = vadd.f32 %v728_v13, %v687_v11 }
 0x218   : > { %1856 = vmatprep.mubr.f32.mxu1 %v735_v15 }
 0x219   : > { %1857 = vmatmul.mubr.f32.gmra.mrb[4].mxu1 %v736_v16 }
 0x2e4   : > { %v1852_v25 = vpop.f32.mrb[0].mxu1 }
 0x2e5   : > { %v832_v26 = vadd.f32 %v1852_v25, %v1642_v24  ;;  %v826_v27 = vpop.f32.mrb[1].mxu1 }
 0x2e6   : > { %v827_v33 = vadd.f32 %v1642_v24, %v826_v27 }
 0x2e7   : > { %v886_v34 = vmul.f32 %v863_v29, %v832_v26 }
 0x2e8   : > { %v885_v12 = vmul.f32 %v858_v22, %v827_v33  ;;  %v1855_v30 = vpop.f32.mrb[2].mxu1 }
 0x2e9   : > { %892 = vst [vmem:[#allocation4 + $0x8] sm:$0xff] %v886_v34  ;;  %v842_v28 = vadd.f32 %v1855_v30, %v1642_v24  ;;  %v836_v36 = vpop.f32.mrb[3].mxu1 }
 0x2ea   : > { %891 = vst [vmem:[#allocation4] sm:$0xff] %v885_v12  ;;  %v837_v32 = vadd.f32 %v1642_v24, %v836_v36 }
 0x2eb   : > { %v888_v37 = vmul.f32 %v873_v35, %v842_v28 }
 0x2ec   : > { %v887_v31 = vmul.f32 %v868_v23, %v837_v32  ;;  %v1858_v38 = vpop.f32.mrb[4].mxu1 }
 0x2ed   : > { %894 = vst [vmem:[#allocation4 + $0x18] sm:$0xff] %v888_v37  ;;  %v852_v39 = vadd.f32 %v1858_v38, %v1642_v24  ;;  %v846_v40 = vpop.f32.mrb[5].mxu1 }
 0x2ee   : > { %893 = vst [vmem:[#allocation4 + $0x10] sm:$0xff] %v887_v31  ;;  %v847_v42 = vadd.f32 %v1642_v24, %v846_v40 }
 0x2ef   : > { %v890_v44 = vmul.f32 %v883_v41, %v852_v39 }
 0x2f0   : > { %v889_v45 = vmul.f32 %v878_v43, %v847_v42 }
 0x2f1   : > { %896 = vst [vmem:[#allocation4 + $0x28] sm:$0xff] %v890_v44 }
 0x2f2   : > { %895 = vst [vmem:[#allocation4 + $0x20] sm:$0xff] %v889_v45 }
 0x2f3 LB: >> { %s3125_s19 = sshll.u32 %s2595_s23, 3  ;;  %v1002_v47 = vld [vmem:[#allocation6] sm:$0x1]  ;;  %s2595_s23 = sphi %s3119_s23, %s998_s23  }
 0x2f4   : >> { %s1000_s1 = sld [smem:[#allocation8 + %s3125_s19]]  ;;  %s1010_s15 = sadd.s32 1, %s3125_s19 }
 0x2f5   : >> { %s1001_s9 = sld [smem:[#allocation9 + %s3125_s19]]  ;;  %s3131_s16 = scalar_lea.vmem [#allocation4], %s3125_s19 }
 0x2f6   : >> { %s1011_s17 = sld [smem:[#allocation9 + %s1010_s15]] }
 0x2f9   : >> { %v1006_v46 = vld [vmem:[%s3131_s16] sm:$0x1] }
 0x2fa   : >> { %s1003_s27 = scalar_lea.vmem [#allocation3], %s1000_s1 }
 0x2fb   : >> { %v1004_v48 = vld [vmem:[%s1003_s27] sm:$0x1] }
 0x2fc   : >> { %v1007_v49 = vmul.f32 %v1006_v46, %v1004_v48  ;;  %p1644_p1 = scmp.eq.s32.totalorder %s1011_s17, %s1001_s9 }
 0x2fd   : >> { %s1017_s24 = scalar_lea.vmem (!%p1644_p1), [#allocation5], %s1001_s9  ;;  %v2611_v52 = vmov (!%p1644_p1), 0.0  }
 0x2fe   : >> { %v1008_v50 = vadd.f32 %v1007_v49, %v1002_v47  ;;  %1015 = sbr.rel (%p1644_p1) target bundleno = 777 (0x309), region = 103 }
 0x300   : >> { %1009 = vst [vmem:[#allocation6] sm:$0x1] %v1008_v50 }
 0x307   : >> { %v1016_v51 = vld [vmem:[#allocation6] sm:$0x1] }
 0x308   : >> { %1018 = vst [vmem:[%s1017_s24] sm:$0x1] %v1016_v51  ;;  %1019 = vst [vmem:[#allocation6] sm:$0x1] %v2611_v52 }
 0x309 PF: >> { %s1020_s21 = sld [smem:[#allocation8 + %s1010_s15]]  ;;  %s1030_s26 = sadd.s32 2, %s3125_s19  ;;  %v1646_v53 = vld [vmem:[%s3131_s16 + $0x1] sm:$0x1] }
 0x30a   : >> { %s1021_s2 = sld [smem:[#allocation9 + %s1010_s15]] }
 0x30b   : >> { %s1031_s25 = sld [smem:[#allocation9 + %s1030_s26]] }
 0x30f   : >> { %v1022_v54 = vld [vmem:[#allocation6] sm:$0x1]  ;;  %s1023_s11 = scalar_lea.vmem [#allocation3], %s1020_s21 }
 0x310   : >> { %v1024_v55 = vld [vmem:[%s1023_s11] sm:$0x1] }
 0x311   : >> { %v1027_v56 = vmul.f32 %v1646_v53, %v1024_v55  ;;  %p1647_p7 = scmp.eq.s32.totalorder %s1031_s25, %s1021_s2 }
 0x312   : >> { %s1037_s28 = scalar_lea.vmem (!%p1647_p7), [#allocation5], %s1021_s2  ;;  %v2612_v59 = vmov (!%p1647_p7), 0.0  }
 0x313   : >> { %v1028_v57 = vadd.f32 %v1027_v56, %v1022_v54  ;;  %1035 = sbr.rel (%p1647_p7) target bundleno = 798 (0x31e), region = 107 }
 0x315   : >> { %1029 = vst [vmem:[#allocation6] sm:$0x1] %v1028_v57 }
 0x31c   : >> { %v1036_v58 = vld [vmem:[#allocation6] sm:$0x1] }
 0x31d   : >> { %1038 = vst [vmem:[%s1037_s28] sm:$0x1] %v1036_v58  ;;  %1039 = vst [vmem:[#allocation6] sm:$0x1] %v2612_v59 }
 0x31e PF: >> { %s1040_s22 = sld [smem:[#allocation8 + %s1030_s26]]  ;;  %s1050_s30 = sadd.s32 3, %s3125_s19  ;;  %v1649_v60 = vld [vmem:[%s3131_s16 + $0x2] sm:$0x1] }
 0x31f   : >> { %s1041_s13 = sld [smem:[#allocation9 + %s1030_s26]] }
 0x320   : >> { %s1051_s4 = sld [smem:[#allocation9 + %s1050_s30]] }
 0x324   : >> { %v1042_v61 = vld [vmem:[#allocation6] sm:$0x1]  ;;  %s1043_s0 = scalar_lea.vmem [#allocation3], %s1040_s22 }
 0x325   : >> { %v1044_v62 = vld [vmem:[%s1043_s0] sm:$0x1] }
 0x326   : >> { %v1047_v63 = vmul.f32 %v1649_v60, %v1044_v62  ;;  %p1650_p11 = scmp.eq.s32.totalorder %s1051_s4, %s1041_s13 }
 0x327   : >> { %s1057_s14 = scalar_lea.vmem (!%p1650_p11), [#allocation5], %s1041_s13  ;;  %v2613_v2 = vmov (!%p1650_p11), 0.0  }
 0x328   : >> { %v1048_v0 = vadd.f32 %v1047_v63, %v1042_v61  ;;  %1055 = sbr.rel (%p1650_p11) target bundleno = 819 (0x333), region = 111 }
 0x32a   : >> { %1049 = vst [vmem:[#allocation6] sm:$0x1] %v1048_v0 }
 0x331   : >> { %v1056_v1 = vld [vmem:[#allocation6] sm:$0x1] }
 0x332   : >> { %1058 = vst [vmem:[%s1057_s14] sm:$0x1] %v1056_v1  ;;  %1059 = vst [vmem:[#allocation6] sm:$0x1] %v2613_v2 }
 0x333 PF: >> { %s1060_s1 = sld [smem:[#allocation8 + %s1050_s30]]  ;;  %s1070_s15 = sadd.s32 4, %s3125_s19  ;;  %v1652_v3 = vld [vmem:[%s3131_s16 + $0x3] sm:$0x1] }
 0x334   : >> { %s1061_s9 = sld [smem:[#allocation9 + %s1050_s30]] }
 0x335   : >> { %s1071_s17 = sld [smem:[#allocation9 + %s1070_s15]] }
 0x339   : >> { %v1062_v4 = vld [vmem:[#allocation6] sm:$0x1]  ;;  %s1063_s27 = scalar_lea.vmem [#allocation3], %s1060_s1 }
 0x33a   : >> { %v1064_v5 = vld [vmem:[%s1063_s27] sm:$0x1] }
 0x33b   : >> { %v1067_v6 = vmul.f32 %v1652_v3, %v1064_v5  ;;  %p1653_p9 = scmp.eq.s32.totalorder %s1071_s17, %s1061_s9 }
 0x33c   : >> { %s1077_s24 = scalar_lea.vmem (!%p1653_p9), [#allocation5], %s1061_s9  ;;  %v2614_v9 = vmov (!%p1653_p9), 0.0  }
 0x33d   : >> { %v1068_v7 = vadd.f32 %v1067_v6, %v1062_v4  ;;  %1075 = sbr.rel (%p1653_p9) target bundleno = 840 (0x348), region = 115 }
 0x33f   : >> { %1069 = vst [vmem:[#allocation6] sm:$0x1] %v1068_v7 }
 0x346   : >> { %v1076_v8 = vld [vmem:[#allocation6] sm:$0x1] }
 0x347   : >> { %1078 = vst [vmem:[%s1077_s24] sm:$0x1] %v1076_v8  ;;  %1079 = vst [vmem:[#allocation6] sm:$0x1] %v2614_v9 }
 0x348 PF: >> { %s1080_s21 = sld [smem:[#allocation8 + %s1070_s15]]  ;;  %s1090_s26 = sadd.s32 5, %s3125_s19  ;;  %v1655_v10 = vld [vmem:[%s3131_s16 + $0x4] sm:$0x1] }
 0x349   : >> { %s1081_s2 = sld [smem:[#allocation9 + %s1070_s15]] }
 0x34a   : >> { %s1091_s25 = sld [smem:[#allocation9 + %s1090_s26]] }
 0x34e   : >> { %v1082_v11 = vld [vmem:[#allocation6] sm:$0x1]  ;;  %s1083_s11 = scalar_lea.vmem [#allocation3], %s1080_s21 }
 0x34f   : >> { %v1084_v13 = vld [vmem:[%s1083_s11] sm:$0x1] }
 0x350   : >> { %v1087_v14 = vmul.f32 %v1655_v10, %v1084_v13  ;;  %p1656_p3 = scmp.eq.s32.totalorder %s1091_s25, %s1081_s2 }
 0x351   : >> { %s1097_s28 = scalar_lea.vmem (!%p1656_p3), [#allocation5], %s1081_s2  ;;  %v2615_v17 = vmov (!%p1656_p3), 0.0  }
 0x352   : >> { %v1088_v15 = vadd.f32 %v1087_v14, %v1082_v11  ;;  %1095 = sbr.rel (%p1656_p3) target bundleno = 861 (0x35d), region = 119 }
 0x354   : >> { %1089 = vst [vmem:[#allocation6] sm:$0x1] %v1088_v15 }
 0x35b   : >> { %v1096_v16 = vld [vmem:[#allocation6] sm:$0x1] }
 0x35c   : >> { %1098 = vst [vmem:[%s1097_s28] sm:$0x1] %v1096_v16  ;;  %1099 = vst [vmem:[#allocation6] sm:$0x1] %v2615_v17 }
 0x35d PF: >> { %s1100_s22 = sld [smem:[#allocation8 + %s1090_s26]]  ;;  %s1110_s30 = sadd.s32 6, %s3125_s19  ;;  %v1658_v20 = vld [vmem:[%s3131_s16 + $0x5] sm:$0x1] }
 0x35e   : >> { %s1101_s13 = sld [smem:[#allocation9 + %s1090_s26]] }
 0x35f   : >> { %s1111_s4 = sld [smem:[#allocation9 + %s1110_s30]] }
 0x363   : >> { %v1102_v21 = vld [vmem:[#allocation6] sm:$0x1]  ;;  %s1103_s0 = scalar_lea.vmem [#allocation3], %s1100_s22 }
 0x364   : >> { %v1104_v22 = vld [vmem:[%s1103_s0] sm:$0x1] }
 0x365   : >> { %v1107_v23 = vmul.f32 %v1658_v20, %v1104_v22  ;;  %p1659_p6 = scmp.eq.s32.totalorder %s1111_s4, %s1101_s13 }
 0x366   : >> { %s1117_s14 = scalar_lea.vmem (!%p1659_p6), [#allocation5], %s1101_s13  ;;  %v2616_v26 = vmov (!%p1659_p6), 0.0  }
 0x367   : >> { %v1108_v24 = vadd.f32 %v1107_v23, %v1102_v21  ;;  %1115 = sbr.rel (%p1659_p6) target bundleno = 882 (0x372), region = 123 }
 0x369   : >> { %1109 = vst [vmem:[#allocation6] sm:$0x1] %v1108_v24 }
 0x370   : >> { %v1116_v25 = vld [vmem:[#allocation6] sm:$0x1] }
 0x371   : >> { %1118 = vst [vmem:[%s1117_s14] sm:$0x1] %v1116_v25  ;;  %1119 = vst [vmem:[#allocation6] sm:$0x1] %v2616_v26 }
 0x372 PF: >> { %s1120_s1 = sld [smem:[#allocation8 + %s1110_s30]]  ;;  %s1130_s15 = sadd.s32 7, %s3125_s19  ;;  %v1661_v27 = vld [vmem:[%s3131_s16 + $0x6] sm:$0x1] }
 0x373   : >> { %s1121_s9 = sld [smem:[#allocation9 + %s1110_s30]] }
 0x374   : >> { %s1131_s17 = sld [smem:[#allocation9 + %s1130_s15]] }
 0x378   : >> { %v1122_v29 = vld [vmem:[#allocation6] sm:$0x1]  ;;  %s1123_s27 = scalar_lea.vmem [#allocation3], %s1120_s1 }
 0x379   : >> { %v1124_v33 = vld [vmem:[%s1123_s27] sm:$0x1] }
 0x37a   : >> { %v1127_v34 = vmul.f32 %v1661_v27, %v1124_v33  ;;  %p1662_p10 = scmp.eq.s32.totalorder %s1131_s17, %s1121_s9 }
 0x37b   : >> { %s1137_s24 = scalar_lea.vmem (!%p1662_p10), [#allocation5], %s1121_s9  ;;  %v2617_v30 = vmov (!%p1662_p10), 0.0  }
 0x37c   : >> { %v1128_v35 = vadd.f32 %v1127_v34, %v1122_v29  ;;  %1135 = sbr.rel (%p1662_p10) target bundleno = 903 (0x387), region = 127 }
 0x37e   : >> { %1129 = vst [vmem:[#allocation6] sm:$0x1] %v1128_v35 }
 0x385   : >> { %v1136_v12 = vld [vmem:[#allocation6] sm:$0x1] }
 0x386   : >> { %1138 = vst [vmem:[%s1137_s24] sm:$0x1] %v1136_v12  ;;  %1139 = vst [vmem:[#allocation6] sm:$0x1] %v2617_v30 }
 0x387 PF: >> { %s1140_s21 = sld [smem:[#allocation8 + %s1130_s15]]  ;;  %s1150_s26 = sadd.s32 8, %s3125_s19  ;;  %v1664_v28 = vld [vmem:[%s3131_s16 + $0x7] sm:$0x1] }
 0x388   : >> { %s1141_s2 = sld [smem:[#allocation9 + %s1130_s15]] }
 0x389   : >> { %s1151_s25 = sld [smem:[#allocation9 + %s1150_s26]] }
 0x38d   : >> { %v1142_v36 = vld [vmem:[#allocation6] sm:$0x1]  ;;  %s1143_s11 = scalar_lea.vmem [#allocation3], %s1140_s21 }
 0x38e   : >> { %v1144_v32 = vld [vmem:[%s1143_s11] sm:$0x1] }
 0x38f   : >> { %v1147_v37 = vmul.f32 %v1664_v28, %v1144_v32  ;;  %p1665_p12 = scmp.eq.s32.totalorder %s1151_s25, %s1141_s2 }
 0x390   : >> { %s1157_s28 = scalar_lea.vmem (!%p1665_p12), [#allocation5], %s1141_s2  ;;  %v2618_v39 = vmov (!%p1665_p12), 0.0  }
 0x391   : >> { %v1148_v31 = vadd.f32 %v1147_v37, %v1142_v36  ;;  %1155 = sbr.rel (%p1665_p12) target bundleno = 924 (0x39c), region = 131 }
 0x393   : >> { %1149 = vst [vmem:[#allocation6] sm:$0x1] %v1148_v31 }
 0x39a   : >> { %v1156_v38 = vld [vmem:[#allocation6] sm:$0x1] }
 0x39b   : >> { %1158 = vst [vmem:[%s1157_s28] sm:$0x1] %v1156_v38  ;;  %1159 = vst [vmem:[#allocation6] sm:$0x1] %v2618_v39 }
 0x39c PF: >> { %s998_s23 = sadd.s32 1, %s2595_s23  }
 0x39d   : >> { %p995_p0 = scmp.ge.s32.totalorder %s998_s23, 6  }
 0x39e   : > { %v1162_v40 = vld [vmem:[%s3016_s29] sm:$0xff] (%p995_p0)  ;;  %v1163_v41 = vld [vmem:[%s3016_s29 + $0x8] sm:$0xff] (%p995_p0)  ;;  %v1164_v42 = vld [vmem:[%s3016_s29 + $0x10] sm:$0xff] (%p995_p0)  ;;  %p1669_p2 = scmp.ne.s32.totalorder (%p995_p0), %s2721_s20, 1 }
 0x39f   : > { %v2060_v43 = vpack.c.bf16 (%p995_p0), %v1163_v41, %v1162_v40  ;;  %v1165_v44 = vld [vmem:[%s3016_s29 + $0x18] sm:$0xff] (%p995_p0)  ;;  %v1166_v46 = vld [vmem:[%s3016_s29 + $0x20] sm:$0xff] (%p995_p0)  ;;  %v1167_v47 = vld [vmem:[%s3016_s29 + $0x28] sm:$0xff] (%p995_p0) }
 0x3a0   : > { %997 = sbr.rel (!%p995_p0) target bundleno = 755 (0x2f3), region = 218  ;;  %v2064_v45 = vpack.c.bf16 (%p995_p0), %v1165_v44, %v1164_v42  ;;  %v2068_v48 = vpack.c.bf16 (%p995_p0), %v1167_v47, %v1166_v46  ;;  %v1168_v50 = vld [vmem:[%s3016_s29 + $0x30] sm:$0xff] (%p995_p0)  ;;  %v1169_v51 = vld [vmem:[%s3016_s29 + $0x38] sm:$0xff] (%p995_p0)  ;;  %v1170_v53 = vld [vmem:[%s3016_s29 + $0x40] sm:$0xff] (%p995_p0) }
 0x3a1   : > { %2061 = vmatprep.subr.bf16.mxu1 (%p995_p0), %v2060_v43  ;;  %v2072_v52 = vpack.c.bf16 (%p995_p0), %v1169_v51, %v1168_v50  ;;  %v1171_v54 = vld [vmem:[%s3016_s29 + $0x48] sm:$0xff] (%p995_p0)  ;;  %v1172_v56 = vld [vmem:[%s3016_s29 + $0x50] sm:$0xff] (%p995_p0)  ;;  %v1173_v57 = vld [vmem:[%s3016_s29 + $0x58] sm:$0xff] (%p995_p0) }
 0x3a2   : > { %2063 = vmatpush3.bf16.msra.mxu1 (%p995_p0), %v2060_v43  ;;  %v1160_v49 = vld [vmem:[#allocation5] sm:$0xff] (%p995_p0)  ;;  %v2076_v55 = vpack.c.bf16 (%p995_p0), %v1171_v54, %v1170_v53  ;;  %v2080_v58 = vpack.c.bf16 (%p995_p0), %v1173_v57, %v1172_v56  ;;  %v1174_v59 = vld [vmem:[%s3016_s29 + $0x60] sm:$0xff] (%p995_p0)  ;;  %v1177_v63 = vld [vmem:[%s3016_s29 + $0x78] sm:$0xff] (%p995_p0) }
 0x3a3   : > { %2065 = vmatprep.subr.bf16.mxu1 (%p995_p0), %v2064_v45  ;;  %1926 = vmatprep.mubr.f32.mxu1 (%p995_p0), %v1160_v49  ;;  %v1175_v60 = vld [vmem:[%s3016_s29 + $0x68] sm:$0xff] (%p995_p0)  ;;  %v1176_v62 = vld [vmem:[%s3016_s29 + $0x70] sm:$0xff] (%p995_p0) }
 0x3a4   : > { %v2084_v61 = vpack.c.bf16 (%p995_p0), %v1175_v60, %v1174_v59  ;;  %v2088_v0 = vpack.c.bf16 (%p995_p0), %v1177_v63, %v1176_v62  ;;  %v1161_v1 = vld [vmem:[#allocation5 + $0x8] sm:$0xff] (%p995_p0)  ;;  %v1666_v2 = vld [vmem:[%s555_s12] ss:$0 sm:$0xff] (%p995_p0) }
 0x3a6   : > { %2067 = vmatpush3.bf16.msra.mxu1 (%p995_p0), %v2064_v45 }
 0x3a7   : > { %2069 = vmatprep.subr.bf16.mxu1 %v2068_v48  ;;  %v1306_v49 = vld [vmem:[#allocation19] sm:$0xff] (!%p1669_p2)  ;;  %v1307_v50 = vld [vmem:[#allocation19 + $0x8] sm:$0xff] (!%p1669_p2)  ;;  %v1308_v51 = vld [vmem:[#allocation19 + $0x10] sm:$0xff] (!%p1669_p2)  ;;  %s3284_s12 = sld [smem:[#allocation34_spill]] (!%p1669_p2) }
 0x3a8   : > { %v1309_v53 = vld [vmem:[#allocation19 + $0x18] sm:$0xff] (!%p1669_p2)  ;;  %v1311_v56 = vld [vmem:[#allocation19 + $0x28] sm:$0xff] (!%p1669_p2)  ;;  %v1312_v57 = vld [vmem:[#allocation19 + $0x30] sm:$0xff] (!%p1669_p2) }
 0x3a9   : > { %v2096_v54 = vpack.c.bf16 (!%p1669_p2), %v1309_v53, %v1308_v51  ;;  %v1314_v59 = vld [vmem:[#allocation19 + $0x40] sm:$0xff] (!%p1669_p2)  ;;  %v1315_v60 = vld [vmem:[#allocation19 + $0x48] sm:$0xff] (!%p1669_p2)  ;;  %v1316_v62 = vld [vmem:[#allocation19 + $0x50] sm:$0xff] (!%p1669_p2) }
 0x3aa   : > { %2071 = vmatpush3.bf16.msra.mxu1 %v2068_v48  ;;  %v1317_v63 = vld [vmem:[#allocation19 + $0x58] sm:$0xff] (!%p1669_p2) }
 0x3ab   : > { %2073 = vmatprep.subr.bf16.mxu1 %v2072_v52 }
 0x3ae   : > { %2075 = vmatpush3.bf16.msra.mxu1 %v2072_v52  ;;  %v2092_v52 = vpack.c.bf16 (!%p1669_p2), %v1307_v50, %v1306_v49 }
 0x3af   : > { %2077 = vmatprep.subr.bf16.mxu1 %v2076_v55 }
 0x3b0   : > { %2093 = vmatprep.subr.bf16.mxu0 (!%p1669_p2), %v2092_v52 }
 0x3b1   : > { %2095 = vmatpush3.bf16.msra.mxu0 (!%p1669_p2), %v2092_v52 }
 0x3b2   : > { %2079 = vmatpush3.bf16.msra.mxu1 %v2076_v55  ;;  %v1310_v55 = vld [vmem:[#allocation19 + $0x20] sm:$0xff] (!%p1669_p2)  ;;  %2097 = vmatprep.subr.bf16.mxu0 (!%p1669_p2), %v2096_v54 }
 0x3b3   : > { %2081 = vmatprep.subr.bf16.mxu1 %v2080_v58 }
 0x3b5   : > { %2099 = vmatpush3.bf16.msra.mxu0 (!%p1669_p2), %v2096_v54 }
 0x3b6   : > { %2083 = vmatpush3.bf16.msra.mxu1 %v2080_v58 }
 0x3b7   : > { %2085 = vmatprep.subr.bf16.mxu1 %v2084_v61 }
 0x3ba   : > { %2087 = vmatpush3.bf16.msra.mxu1 %v2084_v61  ;;  %v2108_v61 = vpack.c.bf16 (!%p1669_p2), %v1315_v60, %v1314_v59 }
 0x3bb   : > { %2089 = vmatprep.subr.bf16.mxu1 %v2088_v0 }
 0x3be   : > { %2091 = vmatpush3.bf16.msra.mxu1 %v2088_v0  ;;  %v2112_v0 = vpack.c.bf16 (!%p1669_p2), %v1317_v63, %v1316_v62 }
 0x3c1   : > { %1927 = vmatmul.mubr.f32.vlgmr.msra.gmra.mrb[6].mxu1 %v1161_v1  ;;  %v1318_v1 = vld [vmem:[#allocation19 + $0x60] sm:$0xff] (!%p1669_p2) }
 0x494   : > { %v1928_v3 = vpop.f32.mrb[6].mxu1 }
 0x495   : > { %v1257_v4 = vadd.f32 %v1928_v3, %v1666_v2  ;;  %v1251_v5 = vpop.f32.mrb[7].mxu1 }
 0x496   : > { %v1252_v6 = vadd.f32 %v1666_v2, %v1251_v5  ;;  %v1319_v2 = vld [vmem:[#allocation19 + $0x68] sm:$0xff] (!%p1669_p2)  ;;  %v1321_v5 = vld [vmem:[#allocation19 + $0x78] sm:$0xff] (!%p1669_p2) }
 0x497   : > { %v1263_v7 = vand.u32 2147483647, %v1257_v4  ;;  %v1261_v22 = vmax.f32 %v1257_v4, 0.0  ;;  %v2116_v3 = vpack.c.bf16 (!%p1669_p2), %v1319_v2, %v1318_v1  ;;  %v1320_v4 = vld [vmem:[#allocation19 + $0x70] sm:$0xff] (!%p1669_p2) }
 0x498   : > { %v1262_v8 = vand.u32 2147483647, %v1252_v6  ;;  %v1260_v24 = vmax.f32 %v1252_v6, 0.0  ;;  %v2120_v6 = vpack.c.bf16 (!%p1669_p2), %v1321_v5, %v1320_v4 }
 0x499   : > { %v1265_v9 = vsub.f32 0.0, %v1263_v7  ;;  %v1670_v7 = vld [vmem:[%s3284_s12] ss:$0 sm:$0xff] (!%p1669_p2) }
 0x49a   : > { %v1264_v10 = vsub.f32 0.0, %v1262_v8 }
 0x49b   : > { %v1268_v11 = vmul.f32 1.442695, %v1265_v9 }
 0x49c   : > { %v1266_v13 = vmul.f32 1.442695, %v1264_v10 }
 0x49d   : > { %2267 = vpow2.f32 %v1268_v11 }
 0x49e   : > { %2269 = vpow2.f32 %v1266_v13 }
 0x4a7   : > { %v2268_v14 = vpop.eup %2267 }
 0x4a8   : > { %v2270_v15 = vpop.eup %2269  ;;  %v1271_v16 = vadd.f32 1.0, %v2268_v14 }
 0x4a9   : > { %v1270_v17 = vadd.f32 1.0, %v2270_v15 }
 0x4aa   : > { %2271 = vlog2.f32 %v1271_v16 }
 0x4ab   : > { %2273 = vlog2.f32 %v1270_v17 }
 0x4b4   : > { %v2272_v20 = vpop.eup %2271 }
 0x4b5   : > { %v2274_v21 = vpop.eup %2273  ;;  %v1275_v23 = vmul.f32 0.6931472, %v2272_v20 }
 0x4b6   : > { %v1273_v25 = vmul.f32 0.6931472, %v2274_v21 }
 0x4b7   : > { %v1277_v26 = vadd.f32 %v1275_v23, %v1261_v22 }
 0x4b8   : > { %v1276_v27 = vadd.f32 %v1273_v25, %v1260_v24 }
 0x4b9   : > { %v1668_v29 = vadd.f32 -0.6931472, %v1277_v26 }
 0x4ba   : > { %v1667_v33 = vadd.f32 -0.6931472, %v1276_v27 }
 0x4bb   : > { %v1283_v34 = vand.u32 2147483647, %v1668_v29  ;;  %v1281_v41 = vmax.f32 %v1668_v29, 0.0 }
 0x4bc   : > { %v1282_v35 = vand.u32 2147483647, %v1667_v33  ;;  %v1280_v43 = vmax.f32 %v1667_v33, 0.0 }
 0x4bd   : > { %v1285_v12 = vsub.f32 0.0, %v1283_v34 }
 0x4be   : > { %v1284_v30 = vsub.f32 0.0, %v1282_v35 }
 0x4bf   : > { %v1288_v28 = vmul.f32 1.442695, %v1285_v12 }
 0x4c0   : > { %v1286_v36 = vmul.f32 1.442695, %v1284_v30 }
 0x4c1   : > { %2275 = vpow2.f32 %v1288_v28 }
 0x4c2   : > { %2277 = vpow2.f32 %v1286_v36 }
 0x4cb   : > { %v2276_v32 = vpop.eup %2275 }
 0x4cc   : > { %v2278_v37 = vpop.eup %2277  ;;  %v1291_v31 = vadd.f32 1.0, %v2276_v32 }
 0x4cd   : > { %v1290_v38 = vadd.f32 1.0, %v2278_v37 }
 0x4ce   : > { %2279 = vlog2.f32 %v1291_v31 }
 0x4cf   : > { %2281 = vlog2.f32 %v1290_v38 }
 0x4d8   : > { %v2280_v39 = vpop.eup %2279 }
 0x4d9   : > { %v2282_v40 = vpop.eup %2281  ;;  %v1295_v42 = vmul.f32 0.6931472, %v2280_v39 }
 0x4da   : > { %v1293_v44 = vmul.f32 0.6931472, %v2282_v40  ;;  %1305 = sbr.rel (%p1669_p2) target bundleno = 1487 (0x5cf), region = 135 }
 0x4db   : > { %v1297_v45 = vadd.f32 %v1295_v42, %v1281_v41 }
 0x4dc   : > { %v1296_v46 = vadd.f32 %v1293_v44, %v1280_v43 }
 0x4dd   : > { %v1299_v47 = vadd.f32 %v1297_v45, %v3104_v19  ;;  %v2100_v19 = vpack.c.bf16 (!%p1669_p2), %v1311_v56, %v1310_v55 }
 0x4de   : > { %v1298_v48 = vadd.f32 %v1296_v46, %v3102_v18  ;;  %v1313_v18 = vld [vmem:[#allocation19 + $0x38] sm:$0xff] (!%p1669_p2) }
 0x4df   : > { %1301 = vst [vmem:[#allocation2 + $0x8] sm:$0xff] %v1299_v47  ;;  %2101 = vmatprep.subr.bf16.mxu0 (!%p1669_p2), %v2100_v19  ;;  %v2104_v58 = vpack.c.bf16 (!%p1669_p2), %v1313_v18, %v1312_v57 }
 0x4e0   : > { %1300 = vst [vmem:[#allocation2] sm:$0xff] %v1298_v48  ;;  %1961 = vmatprep.mubr.f32.mxu0 (!%p1669_p2), %v1298_v48  ;;  %2103 = vmatpush3.bf16.msra.mxu0 (!%p1669_p2), %v2100_v19 }
 0x4e1   : > { %2105 = vmatprep.subr.bf16.mxu0 %v2104_v58 }
 0x4e4   : > { %2107 = vmatpush3.bf16.msra.mxu0 %v2104_v58 }
 0x4e5   : > { %2109 = vmatprep.subr.bf16.mxu0 %v2108_v61 }
 0x4e8   : > { %2111 = vmatpush3.bf16.msra.mxu0 %v2108_v61 }
 0x4e9   : > { %2113 = vmatprep.subr.bf16.mxu0 %v2112_v0 }
 0x4ec   : > { %2115 = vmatpush3.bf16.msra.mxu0 %v2112_v0 }
 0x4ed   : > { %2117 = vmatprep.subr.bf16.mxu0 %v2116_v3 }
 0x4f0   : > { %2119 = vmatpush3.bf16.msra.mxu0 %v2116_v3 }
 0x4f1   : > { %2121 = vmatprep.subr.bf16.mxu0 %v2120_v6 }
 0x4f4   : > { %2123 = vmatpush3.bf16.msra.mxu0 %v2120_v6 }
 0x4f7   : > { %1962 = vmatmul.mubr.f32.vlgmr.msra.gmra.mrb[0].mxu0 %v1299_v47 }
 0x5ca   : > { %v1963_v8 = vpop.f32.mrb[0].mxu0 }
 0x5cb   : > { %v1401_v9 = vadd.f32 %v1963_v8, %v1670_v7  ;;  %v1395_v10 = vpop.f32.mrb[1].mxu0 }
 0x5cc   : > { %v1396_v11 = vadd.f32 %v1670_v7, %v1395_v10 }
 0x5cd   : > { %1405 = vst [vmem:[#allocation20 + $0x8] sm:$0xff] %v1401_v9 }
 0x5ce   : > { %1404 = vst [vmem:[#allocation20] sm:$0xff] %v1396_v11 }
 0x5cf PF: > { %p2178_p5 = scmp.eq.s32.totalorder %s2721_s20, 1  ;;  %s2619_s22 = smov [#allocation20]  }
 0x5d0   : > { %s1412_s13 = sshll.u32 %s2619_s22, 4  ;;  %s1413_s13 = int_to_ptr.vmem [resolvable:$true] %s1412_s13 }
 0x5d1   : > { %s2509_s30 = scalar_lea.vmem %s1413_s13, 256  ;;  %p2516_p1 = scmp.lt.s32.totalorder %s1413_s13, %s1413_s13 }
 0x5d2   : > { %p2510_p13 = scmp.ne.s32.totalorder %s1413_s13, %s2509_s30  ;;  %p2517_p7 = scmp.lt.s32.totalorder %s2509_s30, %s2509_s30 }
 0x5d4   : > { %p2511_p4 = pnand %p2510_p13, %p2178_p5  ;;  %p2518_p11 = por %p2517_p7, %p2516_p1 }
 0x5d6   : > { %p2512_p8 = pneg %p2511_p4 }
 0x5d8   : > { %p2519_p9 = pnand %p2518_p11, %p2512_p8 }
 0x5da   : > { %2522 = shalt.err (!%p2519_p9)
}
 0x5db   : > { %s3285_s14 = sld [smem:[#allocation35_spill]] }
 0x5e1   : > { %s2523_s1 = scalar_lea.hbm %s3285_s14, 256 }
 0x5e2   : > { %p2524_p3 = scmp.ne.s32.totalorder %s3285_s14, %s2523_s1  ;;  %p2529_p12 = scmp.lt.u32.totalorder %s2523_s1, %s3285_s14 }
 0x5e4   : > { %p2525_p6 = pnand %p2524_p3, %p2178_p5 }
 0x5e6   : > { %p2526_p10 = pneg %p2525_p6 }
 0x5e8   : > { %p2531_p0 = pnand %p2529_p12, %p2526_p10 }
 0x5ea   : > { %2534 = shalt.err (!%p2531_p0)
}
 0x5eb   : > { %s2620_s24 = smov 128   ;;  %s2621_s21 = smov 8  }
 0x5ec   : > { %2145 = dma.vmem_to_hbm [thread:$0]  (%p2178_p5), %s1413_s13, 256, %s3285_s14, [#allocation12], %s2620_s24, %s2620_s24, %s2621_s21  }
 0x5ed   : > { %2574 = dma.done.wait (%p2178_p5), [#allocation12], 256  }
 0x5ee   : > { %2576 = vsyncadd (%p2178_p5), [#allocation12], 4294967040 }
 0x5ef PF: > { %s3286_s19 = sld [smem:[#allocation28_spill]]  ;;  %s3287_s25 = sld [smem:[#allocation27_spill]] }
 0x5f0   : > { %s3288_s1 = sld [smem:[#allocation29_spill]]  ;;  %s3289_s0 = smov %s2583_s18 }
 0x5f5   : > { %p30_p2 = scmp.ge.s32.totalorder %s3286_s19, 4   ;;  %s3290_s18 = smov %s3287_s25 }
 0x5f7   :  { %32 = sbr.rel (!%p30_p2) target bundleno = 27 (0x1b), region = 229 }
 0x5fe   :  { %1428 = vsyncpa [#allocation11], 1 }
 0x5ff   :  { %1430 = vsyncpa [#allocation11 + $0x1], 1 }
 0x600   :  { %1431 = vsyncpa [#allocation14], 1 }
 0x601   :  { %1432 = vsyncpa [#allocation12], 1 }
 0x602   :  { %1434 = vsyncpa [#allocation12 + $0x1], 1 }

</bundles_post_ra>
